<compile_context>
chip_gen: v5e
topology: v5e:2x2
jax: 0.10.0
libtpu: 0.0.40
codegen_flags: <defaults>
</compile_context>

<pallas_src>
import functools

import jax
import jax.numpy as jnp
import numpy as np
from jax import lax
from jax.experimental import pallas as pl
from jax.experimental.pallas import tpu as pltpu


# -----------------------------------------------------------------------------
# Hardware / sizing helpers
# -----------------------------------------------------------------------------

def _vmem_capacity_bytes() -> int:
    """Physical VMEM per TensorCore; conservative default if the query fails."""
    try:
        cap = int(getattr(pltpu.get_tpu_info(), "vmem_capacity_bytes", 0))
        if cap > 0:
            return cap
    except Exception:
        pass
    return 64 << 20  # v7x per-core VMEM (v5e/v6e have 128 MiB).


def _compute_dtype(dt):
    """MXU compute dtype: bf16 stays bf16, everything else goes through f32."""
    return jnp.bfloat16 if dt == jnp.bfloat16 else jnp.float32


def _matmul_precision(compute_dtype):
    # HIGHEST => multi-pass f32 on the MXU (exact for 0/1 selector weights).
    return (lax.Precision.HIGHEST
            if compute_dtype == jnp.float32 else lax.Precision.DEFAULT)


def _pick_channel_block(num_groups, bytes_per_group, tile_budget, batch,
                        sublane_align=None):
    """Largest channel-group block that divides `num_groups`, respects the
    (sublane, 128) block rule when the channel axis is second-to-minor
    (`sublane_align`), fits the double-buffered `tile_budget`, and exposes
    >= 2 total grid steps (megacore / v7x) when possible."""
    if sublane_align is None:
        divisors = [d for d in range(1, num_groups + 1) if num_groups % d == 0]
    else:
        divisors = [d for d in range(sublane_align, num_groups + 1, sublane_align)
                    if num_groups % d == 0]
        divisors.append(num_groups)  # a full-extent block is always legal
    divisors = sorted(set(divisors))
    fitting = [d for d in divisors if d * bytes_per_group <= tile_budget]
    if not fitting:
        fitting = divisors[:1]
    cb = fitting[-1]
    if batch * (num_groups // cb) < 2:  # try to give both TCs work (v7x)
        split = [d for d in fitting if num_groups // d >= 2]
        if split:
            cb = split[-1]
    return cb


# -----------------------------------------------------------------------------
# Lane-dense permutation path (default)
# -----------------------------------------------------------------------------

@functools.lru_cache(maxsize=None)
def _space_to_depth_perm(H, W, dtype_name, transpose):
    """(H*W, H*W) 0/1 permutation P with  out_flat = in_flat @ P, where
    out_flat is the (2i+j, h2, w2)-ordered 4*H2*W2 group flattening.
    `transpose=True` gives the inverse permutation (the un-squeeze)."""
    H2, W2 = H // 2, W // 2
    S = H * W
    h = np.arange(H).reshape(H, 1)
    w = np.arange(W).reshape(1, W)
    src = (h * W + w).ravel()
    dst = (((h % 2) * 2 + (w % 2)) * (H2 * W2) + (h // 2) * W2 + (w // 2)).ravel()
    P = np.zeros((S, S), dtype=np.float32)
    P[src, dst] = 1.0
    if transpose:
        P = P.T
    return jnp.asarray(P, dtype=dtype_name)


def _flat_perm_kernel(x_ref, p_ref, o_ref):
    # x_ref: (cb, S) lane-dense slab, p_ref: (S, S) resident permutation,
    # o_ref: (cb, S) lane-dense slab.  One MXU matmul per grid step.
    x = x_ref[...]
    if x.dtype != p_ref.dtype:
        x = x.astype(p_ref.dtype)  # only for non-f32/bf16 inputs
    prec = _matmul_precision(p_ref.dtype)
    o_ref[...] = jnp.dot(
        x, p_ref[...], precision=prec,
        preferred_element_type=jnp.float32).astype(o_ref.dtype)


# -----------------------------------------------------------------------------
# Plane fallback path (large spatial planes)
# -----------------------------------------------------------------------------

def _gather_mat(half, full, parity, dtype):
    """(half, full) matrix G with G[a, b] = 1 iff b == 2a + parity."""
    a = lax.broadcasted_iota(jnp.int32, (half, full), 0)
    b = lax.broadcasted_iota(jnp.int32, (half, full), 1)
    return (b == 2 * a + parity).astype(dtype)


def _scatter_mat(full, half, parity, dtype):
    """(full, half) matrix S with S[b, a] = 1 iff b == 2a + parity."""
    b = lax.broadcasted_iota(jnp.int32, (full, half), 0)
    a = lax.broadcasted_iota(jnp.int32, (full, half), 1)
    return (b == 2 * a + parity).astype(dtype)


def _plane_fwd_kernel(x_ref, o_ref):
    # x_ref: (cb, H, W);  o_ref: (4*cb, H2, W2)
    cb, H, W = x_ref.shape
    H2, W2 = H // 2, W // 2
    cdt = _compute_dtype(x_ref.dtype)
    prec = _matmul_precision(cdt)
    rsel = [_gather_mat(H2, H, i, cdt) for i in range(2)]   # (H2, H) row pick
    csel = [_scatter_mat(W, W2, j, cdt) for j in range(2)]  # (W, W2) col pick

    def body(c, carry):
        x = x_ref[c]
        if x.dtype != cdt:
            x = x.astype(cdt)
        for i in range(2):
            rows = jnp.dot(rsel[i], x, precision=prec,
                           preferred_element_type=jnp.float32).astype(cdt)
            for j in range(2):
                out = jnp.dot(rows, csel[j], precision=prec,
                              preferred_element_type=jnp.float32)
                o_ref[4 * c + 2 * i + j] = out.astype(o_ref.dtype)
        return carry

    lax.fori_loop(0, cb, body, 0, unroll=2)


def _plane_rev_kernel(x_ref, o_ref):
    # x_ref: (4*cb, H, W);  o_ref: (cb, 2H, 2W)
    cb, Ho, Wo = o_ref.shape
    Hi, Wi = Ho // 2, Wo // 2
    cdt = _compute_dtype(x_ref.dtype)
    prec = _matmul_precision(cdt)
    rexp = [_scatter_mat(Ho, Hi, i, cdt) for i in range(2)]  # (Ho, Hi) row scatter
    cexp = [_gather_mat(Wi, Wo, j, cdt) for j in range(2)]   # (Wi, Wo) col scatter

    def body(c, carry):
        acc = jnp.zeros((Ho, Wo), jnp.float32)
        for i in range(2):
            for j in range(2):
                xk = x_ref[4 * c + 2 * i + j]
                if xk.dtype != cdt:
                    xk = xk.astype(cdt)
                t = jnp.dot(rexp[i], xk, precision=prec,
                            preferred_element_type=jnp.float32).astype(cdt)
                acc = acc + jnp.dot(t, cexp[j], precision=prec,
                                    preferred_element_type=jnp.float32)
        o_ref[c] = acc.astype(o_ref.dtype)
        return carry

    lax.fori_loop(0, cb, body, 0, unroll=2)


# -----------------------------------------------------------------------------
# Public wrapper
# -----------------------------------------------------------------------------

def squeeze2d(x: jax.Array, reverse: bool = False, *,
              flat_budget_bytes: int = 8 << 20) -> jax.Array:
    """Pallas implementation of Squeeze2d.forward(x, reverse)."""
    B, C, H, W = x.shape
    itemsize = np.dtype(x.dtype).itemsize
    cdt = _compute_dtype(x.dtype)
    p_itemsize = np.dtype(cdt).itemsize
    cap = _vmem_capacity_bytes()
    # Generation-aware tile budget: ~24 MiB on 128-MiB-VMEM chips (v5e/v6e),
    # ~12 MiB on v7x (64 MiB VMEM). vmem_limit_bytes is raised to match.
    tile_budget = min(24 << 20, max(4 << 20, cap // 5))

    if not reverse:
        assert H % 2 == 0 and W % 2 == 0, "spatial dims must be even"
        Cg, S = C, H * W
        out4d = (B, 4 * C, H // 2, W // 2)
        full_h, full_w, transpose = H, W, False
    else:
        assert C % 4 == 0, "channels must be divisible by 4 for reverse"
        Cg, S = C // 4, 4 * H * W
        out4d = (B, C // 4, 2 * H, 2 * W)
        full_h, full_w, transpose = 2 * H, 2 * W, True

    p_bytes = S * S * p_itemsize
    use_flat = (p_bytes <= flat_budget_bytes) and (2 * p_bytes <= cap // 2)

    if use_flat:
        # Lane-dense flattened-spatial path: one permutation matmul per step.
        sub = {4: 8, 2: 16, 1: 32}.get(itemsize, 8)   # sublane alignment rule
        bytes_per_group = 2 * 2 * S * itemsize        # dbuf x (in + out)
        cb = _pick_channel_block(Cg, bytes_per_group, tile_budget, B,
                                 sublane_align=sub)
        needed = cb * bytes_per_group + 2 * p_bytes + (8 << 20)
        vlimit = int(min(cap - (4 << 20), max(32 << 20, needed)))
        P = _space_to_depth_perm(full_h, full_w, np.dtype(cdt).name, transpose)
        x_flat = x.reshape(B, Cg, S)                  # free, contiguous view
        out_flat = pl.pallas_call(
            _flat_perm_kernel,
            out_shape=jax.ShapeDtypeStruct((B, Cg, S), x.dtype),
            grid=(B, Cg // cb),
            in_specs=[pl.BlockSpec((None, cb, S), lambda b, c: (b, c, 0)),
                      pl.BlockSpec((S, S), lambda b, c: (0, 0))],  # resident P
            out_specs=pl.BlockSpec((None, cb, S), lambda b, c: (b, c, 0)),
            compiler_params=pltpu.CompilerParams(
                dimension_semantics=("parallel", "parallel"),
                vmem_limit_bytes=vlimit),
        )(x_flat, P)
        return out_flat.reshape(out4d)                # free, contiguous view

    # Plane fallback path (large spatial planes). Note: planes are assumed to
    # fit VMEM whole; Glow-scale images always do (even 2048x2048 f32 fits the
    # v7x budget at cb=1), so no H-row sub-tiling is implemented here.
    if not reverse:
        H2, W2 = H // 2, W // 2
        bytes_per_group = 2 * 2 * H * W * itemsize
        cb = _pick_channel_block(C, bytes_per_group, tile_budget, B)
        needed = cb * bytes_per_group + (8 << 20)
        vlimit = int(min(cap - (4 << 20), max(32 << 20, needed)))
        return pl.pallas_call(
            _plane_fwd_kernel,
            out_shape=jax.ShapeDtypeStruct((B, 4 * C, H2, W2), x.dtype),
            grid=(B, C // cb),
            in_specs=[pl.BlockSpec((None, cb, H, W), lambda b, c: (b, c, 0, 0))],
            out_specs=pl.BlockSpec((None, 4 * cb, H2, W2),
                                   lambda b, c: (b, c, 0, 0)),
            compiler_params=pltpu.CompilerParams(
                dimension_semantics=("parallel", "parallel"),
                vmem_limit_bytes=vlimit),
        )(x)
    else:
        Cout = C // 4
        bytes_per_group = 2 * 2 * 4 * H * W * itemsize
        cb = _pick_channel_block(Cout, bytes_per_group, tile_budget, B)
        needed = cb * bytes_per_group + (8 << 20)
        vlimit = int(min(cap - (4 << 20), max(32 << 20, needed)))
        return pl.pallas_call(
            _plane_rev_kernel,
            out_shape=jax.ShapeDtypeStruct((B, Cout, 2 * H, 2 * W), x.dtype),
            grid=(B, Cout // cb),
            in_specs=[pl.BlockSpec((None, 4 * cb, H, W),
                                   lambda b, c: (b, c, 0, 0))],
            out_specs=pl.BlockSpec((None, cb, 2 * H, 2 * W),
                                   lambda b, c: (b, c, 0, 0)),
            compiler_params=pltpu.CompilerParams(
                dimension_semantics=("parallel", "parallel"),
                vmem_limit_bytes=vlimit),
        )(x)


# -----------------------------------------------------------------------------
# Pure-JAX reference (matches the PyTorch module exactly)
# -----------------------------------------------------------------------------

def _squeeze2d_ref(x: jax.Array, reverse: bool = False) -> jax.Array:
    B, C, H, W = x.shape
    if not reverse:
        xv = x.reshape(B, C, H // 2, 2, W // 2, 2)
        xv = jnp.transpose(xv, (0, 1, 3, 5, 2, 4))
        return xv.reshape(B, 4 * C, H // 2, W // 2)
    else:
        xv = x.reshape(B, C // 4, 2, 2, H, W)
        xv = jnp.transpose(xv, (0, 1, 4, 2, 5, 3))
        return xv.reshape(B, C // 4, 2 * H, 2 * W)


if __name__ == "__main__":
    key = jax.random.PRNGKey(0)
    B, C, H, W = 2, 4, 16, 16
    x = jax.random.normal(key, (B, C, H, W), dtype=jnp.float32)

    # Default (lane-dense permutation) path: forward + reverse round trip.
    y = squeeze2d(x)                                   # (2, 16, 8, 8)
    x_rt = squeeze2d(y, reverse=True)                  # (2, 4, 16, 16)
    jax.block_until_ready((y, x_rt))

    y_ref = _squeeze2d_ref(x)
    x_rt_ref = _squeeze2d_ref(y_ref, reverse=True)

    assert y.shape == (B, 4 * C, H // 2, W // 2), y.shape
    assert jnp.allclose(y, y_ref, rtol=1e-6, atol=1e-6), "forward mismatch"
    assert jnp.allclose(x_rt, x, rtol=1e-6, atol=1e-6), "round-trip mismatch"
    assert jnp.allclose(x_rt, x_rt_ref, rtol=1e-6, atol=1e-6), "reverse mismatch"

    # Force the plane fallback path (used for large images) and validate it too.
    y_pl = squeeze2d(x, flat_budget_bytes=0)
    x_rt_pl = squeeze2d(y, reverse=True, flat_budget_bytes=0)
    jax.block_until_ready((y_pl, x_rt_pl))
    assert jnp.allclose(y_pl, y_ref, rtol=1e-6, atol=1e-6), "plane fwd mismatch"
    assert jnp.allclose(x_rt_pl, x, rtol=1e-6, atol=1e-6), "plane rev mismatch"

    print("KERNEL_OK")
</pallas_src>

<mosaic_0001>
module attributes {stable_mosaic.version = 11 : i64} {
  func.func @_flat_perm_kernel(%arg0: i32, %arg1: i32, %arg2: memref<1x4x256xf32, #tpu.memory_space<vmem>>, %arg3: memref<256x256xf32, #tpu.memory_space<vmem>>, %arg4: memref<1x4x256xf32, #tpu.memory_space<vmem>>) attributes {dimension_semantics = [#tpu.dimension_semantics<parallel>, #tpu.dimension_semantics<parallel>], iteration_bounds = array<i64: 2, 1>, scalar_prefetch = 0 : i64, scratch_operands = 0 : i64, tpu.core_type = #tpu.core_type<tc>, window_params = [{transform_indices = @transform_0, window_bounds = array<i64: 1, 4, 256>}, {pipeline_mode = #tpu.pipeline_mode<synchronous>, transform_indices = @transform_1, window_bounds = array<i64: 256, 256>}, {transform_indices = @transform_2, window_bounds = array<i64: 1, 4, 256>}]} {
    %c0 = arith.constant 0 : index
    %c0_0 = arith.constant 0 : index
    %c0_1 = arith.constant 0 : index
    %0 = vector.load %arg2[%c0, %c0_0, %c0_1] : memref<1x4x256xf32, #tpu.memory_space<vmem>>, vector<1x4x256xf32>
    %1 = vector.shape_cast %0 : vector<1x4x256xf32> to vector<4x256xf32>
    %c0_2 = arith.constant 0 : index
    %c0_3 = arith.constant 0 : index
    %2 = vector.load %arg3[%c0_2, %c0_3] : memref<256x256xf32, #tpu.memory_space<vmem>>, vector<256x256xf32>
    %cst = arith.constant dense<0.000000e+00> : vector<4x256xf32>
    %3 = tpu.matmul %1, %2, %cst {dimension_numbers = #tpu.dot_dimension_numbers<[1], [0], [0], [1], [0, 0, 1, 1], [], []>, precision = #tpu.contract_precision<fp32>} : vector<4x256xf32>, vector<256x256xf32>, vector<4x256xf32> -> vector<4x256xf32>
    %c0_4 = arith.constant 0 : index
    %c0_5 = arith.constant 0 : index
    %c0_6 = arith.constant 0 : index
    %4 = vector.load %arg4[%c0_4, %c0_5, %c0_6] : memref<1x4x256xf32, #tpu.memory_space<vmem>>, vector<1x4x256xf32>
    %5 = vector.shape_cast %4 : vector<1x4x256xf32> to vector<4x256xf32>
    %6 = vector.shape_cast %3 : vector<4x256xf32> to vector<1x4x256xf32>
    tpu.vector_store %arg4[%c0_4, %c0_5, %c0_6], %6 {strides = array<i32>} : memref<1x4x256xf32, #tpu.memory_space<vmem>>, vector<1x4x256xf32>,
    return
  }
  func.func @transform_0(%arg0: i32, %arg1: i32) -> (i32, i32, i32) {
    %c0_i32 = arith.constant 0 : i32
    %c0_i32_0 = arith.constant 0 : i32
    return %arg0, %arg1, %c0_i32 : i32, i32, i32
  }
  func.func @transform_1(%arg0: i32, %arg1: i32) -> (i32, i32) {
    %c0_i32 = arith.constant 0 : i32
    %c0_i32_0 = arith.constant 0 : i32
    %c0_i32_1 = arith.constant 0 : i32
    return %c0_i32, %c0_i32_0 : i32, i32
  }
  func.func @transform_2(%arg0: i32, %arg1: i32) -> (i32, i32, i32) {
    %c0_i32 = arith.constant 0 : i32
    %c0_i32_0 = arith.constant 0 : i32
    return %arg0, %arg1, %c0_i32 : i32, i32, i32
  }
}

</mosaic_0001>

<bundles_post_ra>
// kernel: tpu_custom_call.1
= control target key start
LH: loop header
LB: loop body
LE: loop exit
PB: predicated region body
PF: predicated region fallthrough
CT: control target
= control target key end

     0   :  { %7 = vsyncpa [#allocation3], 0  ;;  %s3170_s0 = inlined_call_operand.hbm [shape: f32[2,4,256], index: 0, kind: input, shape index: {}]   ;;  %s3171_s1 = inlined_call_operand.hbm [shape: f32[256,256], index: 1, kind: input, shape index: {}]   ;;  %s3172_s2 = inlined_call_operand.hbm [shape: f32[2,4,256], index: 2, kind: output, shape index: {}]  }
   0x1   :  { %9 = vsyncpa [#allocation3 + $0x1], 0 }
   0x2   :  { %10 = vsyncpa [#allocation6], 0 }
   0x3   :  { %11 = vsyncpa [#allocation4], 0 }
   0x4   :  { %13 = vsyncpa [#allocation4 + $0x1], 0  ;;  %s2012_s9 = smov 0   ;;  %s2014_s10 = smov 0  }
   0x5   :  { %s2016_s11 = smov 0   ;;  %s2018_s12 = smov 0  }
   0x6   :  { %s2020_s13 = smov 0   ;;  %s2022_s14 = smov 0  }
   0x7 LB: > { %s1752_s15 = sadd.s32 4294967295, %s1992_s14   ;;  %p1754_p0 = scmp.ge.s32.totalorder %s1992_s14, 1  ;;  %s1992_s14 = sphi %s2022_s14, %s19_s14   ;;  %s1988_s13 = sphi %s2020_s13, %s3311_s13   ;;  %s1984_s12 = sphi %s2018_s12, %s3310_s12   ;;  %s1980_s11 = sphi %s2016_s11, %s3309_s11   ;;  %s1976_s10 = sphi %s2014_s10, %s3308_s10   ;;  %s1972_s9 = sphi %s2012_s9, %s3307_s9  }
   0x8   : > { %p2044_p1 = scmp.eq.s32.totalorder %s1752_s15, 0  ;;  %p113_p2 = scmp.lt.s32.totalorder %s1992_s14, 3 }
   0x9   : > { %s124_s19 = sshll.u32 %s3171_s1, 4  ;;  %s1994_s21 = smov [#allocation5]   ;;  %s125_s19 = int_to_ptr.hbm [resolvable:$true] %s124_s19 }
   0xa   : > { %p2052_p3 = pnand %p1754_p0, %p113_p2  ;;  %s126_s22 = sshll.u32 %s1994_s21, 4  ;;  %s127_s22 = int_to_ptr.vmem [resolvable:$true] %s126_s22 }
   0xb   : > { %p1756_p6 = scmp.ge.s32.totalorder %s1992_s14, 2  ;;  %s1995_s23 = smov 256  }
   0xc   : > { %p1779_p4 = pneg %p2052_p3  ;;  %s1996_s24 = smov 16  }
   0xd   : > { %s1753_s25 = sadd.s32 4294967294, %s1992_s14   ;;  %s31_s26 = sadd.s32 1, %s1988_s13 }
   0xe   : > { %p1780_p5 = pnand %p1779_p4, %p2044_p1  ;;  %s40_s27 = sadd.s32 1, %s1980_s11 }
   0xf   : > { %p33_p7 = scmp.ge.s32.totalorder %s31_s26, 2  ;;  %p47_p8 = scmp.ne.s32.totalorder %s1980_s11, %s1976_s10 }
  0x10   : > { %1782 = dma.hbm_to_vmem [thread:$0]  (!%p1780_p5), %s125_s19, 8192, %s127_s22, [#allocation6], %s1995_s23, %s1995_s23, %s1996_s24  }
  0x11   : > { %p48_p9 = scmp.eq.s32.totalorder %s1992_s14, 0  ;;  %p53_p10 = scmp.ne.s32.totalorder %s1976_s10, %s1972_s9 }
  0x12   : > { %s3313_s26 = smov (%p33_p7, %s31_s26), 0  ;;  %p100_p13 = scmp.eq.s32.totalorder %s1752_s15, 1 }
  0x13   : > { %p2071_p11 = por %p48_p9, %p47_p8  ;;  %p2077_p12 = por %p2044_p1, %p53_p10 }
  0x14   : > { %s35_s30 = ssub.s32 %s1988_s13, %s3313_s26  ;;  %p106_p2 = scmp.eq.s32.totalorder %s1753_s25, 1 }
  0x15   : > { %p38_p0 = scmp.eq.s32.totalorder %s35_s30, 0  ;;  %p2083_p4 = por %p100_p13, %p47_p8 }
  0x16   : > { %p1792_p5 = scmp.lt.s32.totalorder %s1992_s14, 2  ;;  %p2091_p7 = por %p106_p2, %p53_p10 }
  0x17   : > { %s2089_s4 = scalar_select %p38_p0, %s1980_s11, %s40_s27  }
  0x18   : > { %s140_s6 = sand.u32 1, %s1980_s11   ;;  %s1769_s8 = sshll.u32 %s1988_s13, 3 }
  0x19   : > { %s1757_s7 = sshll.u32 %s140_s6, 3  ;;  %s151_s15 = scalar_lea.hbm %s3170_s0, %s1769_s8 }
  0x1a   : > { %s144_s19 = scalar_lea.vmem [#allocation2], %s1757_s7  ;;  %s153_s22 = sshll.u32 %s151_s15, 4  ;;  %s154_s22 = int_to_ptr.hbm [resolvable:$true] %s153_s22 }
  0x1b   : > { %s155_s21 = sshll.u32 %s144_s19, 4  ;;  %p1784_p8 = pnand %p1792_p5, %p2071_p11  ;;  %s156_s21 = int_to_ptr.vmem [resolvable:$true] %s155_s21 }
  0x1c   : > { %s141_s23 = scalar_lea.sflag [#allocation3], %s140_s6  ;;  %164 = sbr.rel (%p2052_p3) target bundleno = 388 (0x184), region = 28 }
  0x1d   : > { %1786 = dma.hbm_to_vmem [thread:$0]  (!%p1784_p8), %s154_s22, 128, %s156_s21, %s141_s23  }
  0x21   : > { %s2105_s24 = sand.u32 1, %s1976_s10  }
  0x22   : > { %s1761_s25 = sshll.u32 %s2105_s24, 3  ;;  %s167_s27 = scalar_lea.sflag [#allocation3], %s2105_s24 }
  0x23   : > { %s2111_s30 = scalar_lea.vmem [#allocation2], %s1761_s25 }
  0x24   : > { %1959 = dma.done.wait (%p2077_p12), %s167_s27, 128  }
  0x25   : > { %1961 = vsyncadd (%p2077_p12), %s167_s27, 4294967168 }
  0x26   : > { %1963 = dma.done.wait (%p2044_p1), [#allocation6], 8192  }
  0x27   : > { %1965 = vsyncadd (%p2044_p1), [#allocation6], 4294959104  ;;  %v228_v0 = vld [vmem:[#allocation5 + $0xf0] sm:$0xff]  ;;  %v226_v1 = vld [vmem:[#allocation5 + $0xe0] sm:$0xff]  ;;  %s1770_s16 = sshll.u32 %s1984_s12, 3  ;;  %s196_s6 = scalar_lea.vmem [#allocation7], %s1761_s25 }
  0x28   : > { %v224_v2 = vld [vmem:[#allocation5 + $0xd0] sm:$0xff]  ;;  %v2121_v3 = vand.u32 4294901760, %v228_v0  ;;  %v2123_v4 = vand.u32 4294901760, %v226_v1  ;;  %v222_v6 = vld [vmem:[#allocation5 + $0xc0] sm:$0xff]  ;;  %s1653_s29 = scalar_lea.hbm %s3172_s2, %s1770_s16  ;;  %s1655_s7 = sshll.u32 %s196_s6, 4  ;;  %vm1635_vm0 = vcmask 1043456   ;;  %s1656_s7 = int_to_ptr.vmem [resolvable:$true] %s1655_s7 }
  0x29   : > { %v2125_v5 = vand.u32 4294901760, %v224_v2  ;;  %v220_v7 = vld [vmem:[#allocation5 + $0xb0] sm:$0xff]  ;;  %v218_v8 = vld [vmem:[#allocation5 + $0xa0] sm:$0xff]  ;;  %v2127_v9 = vand.u32 4294901760, %v222_v6  ;;  %s1657_s8 = sshll.u32 %s1653_s29, 4  ;;  %s1640_s12 = scalar_lea.sflag [#allocation4], %s2105_s24  ;;  %s1658_s8 = int_to_ptr.hbm [resolvable:$true] %s1657_s8 }
  0x2a   : > { %v2129_v10 = vand.u32 4294901760, %v220_v7  ;;  %v2131_v11 = vand.u32 4294901760, %v218_v8  ;;  %v216_v12 = vld [vmem:[#allocation5 + $0x90] sm:$0xff]  ;;  %v214_v13 = vld [vmem:[#allocation5 + $0x80] sm:$0xff]  ;;  %269 = vmatpush.msra.mxu0 %v2121_v3  ;;  %v2135_v14 = vsub.f32 %v228_v0, %v2121_v3  ;;  %v2138_v15 = vsub.f32 %v226_v1, %v2123_v4  ;;  %465 = vmatpush.msra.mxu3 %v2121_v3  ;;  %s1920_s17 = sshra.s32 %s1658_s8, 4  ;;  %s1926_s21 = scalar_lea.hbm %s3172_s2, 16  ;;  %s1921_s17 = int_to_ptr.hbm [resolvable:$true] %s1920_s17 }
  0x2b   : > { %v2142_v16 = vsub.f32 %v224_v2, %v2125_v5  ;;  %v2144_v17 = vand.u32 4294901760, %v216_v12  ;;  %v212_v18 = vld [vmem:[#allocation5 + $0x70] sm:$0xff]  ;;  %v2147_v19 = vsub.f32 %v222_v6, %v2127_v9  ;;  %v2160_v25 = vand.u32 4294901760, %v214_v13  ;;  %v210_v26 = vld [vmem:[#allocation5 + $0x60] sm:$0xff]  ;;  %s1922_s18 = scalar_lea.hbm %s1921_s17, 8  ;;  %p1927_p10 = scmp.lt.s32.totalorder %s1921_s17, %s3172_s2 }
  0x2c   : > { %v2150_v20 = vsub.f32 %v220_v7, %v2129_v10  ;;  %v2153_v21 = vsub.f32 %v218_v8, %v2131_v11  ;;  %271 = vmatpush.msra.mxu0 %v2123_v4  ;;  %412 = vmatpush.msra.mxu2 %v2135_v14  ;;  %v311_v22 = vand.u32 4294901760, %v2135_v14  ;;  %v3188_v23 = vand.u32 4294901760, %v2138_v15  ;;  %v208_v34 = vld [vmem:[#allocation5 + $0x50] sm:$0xff]  ;;  %v206_v42 = vld [vmem:[#allocation5 + $0x40] sm:$0xff]  ;;  %p1923_p1 = scmp.ne.s32.totalorder %s1921_s17, %s1922_s18  ;;  %p1928_p11 = scmp.lt.s32.totalorder %s1926_s21, %s1922_s18 }
  0x2d   : > { %v3186_v24 = vand.u32 4294901760, %v2142_v16  ;;  %467 = vmatpush.msra.mxu3 %v2123_v4  ;;  %v3184_v27 = vand.u32 4294901760, %v2147_v19  ;;  %v2164_v28 = vand.u32 4294901760, %v212_v18  ;;  %v2167_v29 = vsub.f32 %v216_v12, %v2144_v17  ;;  %v204_v48 = vld [vmem:[#allocation5 + $0x30] sm:$0xff]  ;;  %v202_v54 = vld [vmem:[#allocation5 + $0x20] sm:$0xff] }
  0x2e   : > { %273 = vmatpush.msra.mxu0 %v2125_v5  ;;  %415 = vmatpush.msra.mxu2 %v2138_v15  ;;  %v312_v30 = vsub.f32 %v2135_v14, %v311_v22  ;;  %v318_v31 = vsub.f32 %v2138_v15, %v3188_v23  ;;  %v3182_v33 = vand.u32 4294901760, %v2150_v20  ;;  %v2182_v35 = vand.u32 4294901760, %v210_v26  ;;  %v197_v55 = vld [vmem:[%s2111_s30] sm:$0xff]  ;;  %v198_v6 = vld [vmem:[#allocation5] sm:$0xff]  ;;  %p1924_p3 = pnand %p1923_p1, %p2083_p4  ;;  %p1929_p12 = por %p1928_p11, %p1927_p10 }
  0x2f   : > { %v324_v32 = vsub.f32 %v2142_v16, %v3186_v24  ;;  %469 = vmatpush.msra.mxu3 %v2125_v5  ;;  %v3180_v36 = vand.u32 4294901760, %v2153_v21  ;;  %v330_v39 = vsub.f32 %v2147_v19, %v3184_v27  ;;  %v2191_v40 = vsub.f32 %v214_v13, %v2160_v25  ;;  %v260_v60 = vld [vmem:[#allocation5 + $0x1f0] sm:$0xff]  ;;  %263 = vst [vmem:[#allocation1] ss:$2 sm:$0xff] %v197_v55  ;;  %v258_v7 = vld [vmem:[#allocation5 + $0x1e0] sm:$0xff] }
  0x30   : > { %275 = vmatpush.msra.mxu0 %v2127_v9  ;;  %v313_v37 = vand.u32 4294901760, %v312_v30  ;;  %418 = vmatpush.msra.mxu2 %v2142_v16  ;;  %v319_v38 = vand.u32 4294901760, %v318_v31  ;;  %v2194_v41 = vand.u32 4294901760, %v208_v34  ;;  %v336_v44 = vsub.f32 %v2150_v20, %v3182_v33  ;;  %v200_v62 = vld [vmem:[#allocation5 + $0x10] sm:$0xff]  ;;  %p1925_p9 = pneg %p1924_p3 }
  0x31   : > { %471 = vmatpush.msra.mxu3 %v2127_v9  ;;  %v325_v43 = vand.u32 4294901760, %v324_v32  ;;  %v3179_v45 = vand.u32 4294901760, %v2167_v29  ;;  %v2202_v46 = vsub.f32 %v212_v18, %v2164_v28  ;;  %v342_v47 = vsub.f32 %v2153_v21, %v3180_v36 }
  0x32   : > { %277 = vmatpush.msra.mxu0 %v2129_v10  ;;  %314 = vmatpush.msra.mxu1 %v313_v37  ;;  %v331_v49 = vand.u32 4294901760, %v330_v39  ;;  %v2210_v50 = vand.u32 4294901760, %v206_v42  ;;  %v3178_v51 = vand.u32 4294901760, %v2191_v40  ;;  %v2214_v52 = vsub.f32 %v210_v26, %v2182_v35  ;;  %p1930_p13 = pnand %p1929_p12, %p1925_p9 }
  0x33   : > { %421 = vmatpush.msra.mxu2 %v2147_v19  ;;  %473 = vmatpush.msra.mxu3 %v2129_v10  ;;  %v2219_v53 = vsub.f32 %v208_v34, %v2194_v41  ;;  %v337_v56 = vand.u32 4294901760, %v336_v44  ;;  %v348_v57 = vsub.f32 %v2167_v29, %v3179_v45  ;;  %v2226_v58 = vand.u32 4294901760, %v204_v48  ;;  %v256_v34 = vld [vmem:[#allocation5 + $0x1d0] sm:$0xff]  ;;  %v246_v45 = vld [vmem:[#allocation5 + $0x180] sm:$0xff] }
  0x34   : > { %279 = vmatpush.msra.mxu0 %v2131_v11  ;;  %320 = vmatpush.msra.mxu1 %v319_v38  ;;  %v3177_v59 = vand.u32 4294901760, %v2202_v46  ;;  %v343_v61 = vand.u32 4294901760, %v342_v47  ;;  %v354_v63 = vsub.f32 %v2191_v40, %v3178_v51  ;;  %v2235_v0 = vand.u32 4294901760, %v202_v54  ;;  %v254_v47 = vld [vmem:[#allocation5 + $0x1c0] sm:$0xff] }
  0x35   : > { %424 = vmatpush.msra.mxu2 %v2150_v20  ;;  %475 = vmatpush.msra.mxu3 %v2131_v11  ;;  %v3175_v1 = vand.u32 4294901760, %v2214_v52  ;;  %v2239_v2 = vsub.f32 %v206_v42, %v2210_v50  ;;  %v3174_v8 = vand.u32 4294901760, %v2219_v53  ;;  %v2244_v12 = vand.u32 4294901760, %v260_v60 }
  0x36   : > { %281 = vmatpush.msra.mxu0 %v2144_v17  ;;  %326 = vmatpush.msra.mxu1 %v325_v43  ;;  %v349_v13 = vand.u32 4294901760, %v348_v57  ;;  %v360_v18 = vsub.f32 %v2202_v46, %v3177_v59  ;;  %v2250_v26 = vand.u32 4294901760, %v200_v62  ;;  %v2253_v30 = vsub.f32 %v204_v48, %v2226_v58 }
  0x37   : > { %427 = vmatpush.msra.mxu2 %v2153_v21  ;;  %477 = vmatpush.msra.mxu3 %v2144_v17  ;;  %v2257_v31 = vand.u32 4294901760, %v198_v6  ;;  %v2259_v32 = vand.u32 4294901760, %v258_v7  ;;  %v355_v37 = vand.u32 4294901760, %v354_v63  ;;  %v366_v38 = vsub.f32 %v2214_v52, %v3175_v1 }
  0x38   : > { %283 = vmatpush.msra.mxu0 %v2160_v25  ;;  %332 = vmatpush.msra.mxu1 %v331_v49  ;;  %v3173_v39 = vand.u32 4294901760, %v2239_v2  ;;  %v2267_v42 = vsub.f32 %v202_v54, %v2235_v0  ;;  %v372_v43 = vsub.f32 %v2219_v53, %v3174_v8  ;;  %v2275_v44 = vsub.f32 %v260_v60, %v2244_v12  ;;  %v252_v60 = vld [vmem:[#allocation5 + $0x1b0] sm:$0xff] }
  0x39   : > { %430 = vmatpush.msra.mxu2 %v2167_v29  ;;  %479 = vmatpush.msra.mxu3 %v2160_v25  ;;  %3227 = vst [vmem:[#allocation11_spill] sm:$0xff] %v2257_v31  ;;  %v361_v48 = vand.u32 4294901760, %v360_v18  ;;  %v3176_v49 = vand.u32 4294901760, %v2253_v30  ;;  %v2280_v54 = vsub.f32 %v200_v62, %v2250_v26  ;;  %v2282_v55 = vand.u32 4294901760, %v256_v34  ;;  %v250_v18 = vld [vmem:[#allocation5 + $0x1a0] sm:$0xff] }
  0x3a   : > { %285 = vmatpush.msra.mxu0 %v2164_v28  ;;  %338 = vmatpush.msra.mxu1 %v337_v56  ;;  %v2287_v56 = vsub.f32 %v198_v6, %v2257_v31  ;;  %v2290_v57 = vsub.f32 %v258_v7, %v2259_v32  ;;  %v378_v62 = vsub.f32 %v2239_v2, %v3173_v39  ;;  %v3181_v63 = vand.u32 4294901760, %v2267_v42 }
  0x3b   : > { %433 = vmatpush.msra.mxu2 %v2191_v40  ;;  %481 = vmatpush.msra.mxu3 %v2164_v28  ;;  %v373_v6 = vand.u32 4294901760, %v372_v43  ;;  %v3183_v7 = vand.u32 4294901760, %v2275_v44  ;;  %v2308_v39 = vsub.f32 %v256_v34, %v2282_v55  ;;  %v2310_v8 = vand.u32 4294901760, %v252_v60  ;;  %v248_v43 = vld [vmem:[#allocation5 + $0x190] sm:$0xff] }
  0x3c   : > { %287 = vmatpush.msra.mxu0 %v2182_v35  ;;  %344 = vmatpush.msra.mxu1 %v343_v61  ;;  %v367_v61 = vand.u32 4294901760, %v366_v38  ;;  %v3185_v38 = vand.u32 4294901760, %v2280_v54  ;;  %v3189_v1 = vand.u32 4294901760, %v2287_v56  ;;  %v390_v34 = vsub.f32 %v2267_v42, %v3181_v63 }
  0x3d   : > { %436 = vmatpush.msra.mxu2 %v2202_v46  ;;  %483 = vmatpush.msra.mxu3 %v2182_v35  ;;  %v2323_v51 = vand.u32 4294901760, %v250_v18  ;;  %v653_v36 = vsub.f32 %v2275_v44, %v3183_v7  ;;  %v3190_v63 = vand.u32 4294901760, %v2308_v39  ;;  %v2338_v33 = vsub.f32 %v252_v60, %v2310_v8 }
  0x3e   : > { %289 = vmatpush.msra.mxu0 %v2194_v41  ;;  %350 = vmatpush.msra.mxu1 %v349_v13  ;;  %v2297_v13 = vand.u32 4294901760, %v254_v47  ;;  %v2345_v27 = vand.u32 4294901760, %v246_v45  ;;  %v402_v60 = vsub.f32 %v2287_v56, %v3189_v1  ;;  %v3228_v14 = vand.u32 4294901760, %v2138_v15 }
  0x3f   : > { %439 = vmatpush.msra.mxu2 %v2214_v52  ;;  %485 = vmatpush.msra.mxu3 %v2194_v41  ;;  %v2353_v24 = vsub.f32 %v250_v18, %v2323_v51  ;;  %v665_v1 = vsub.f32 %v2308_v39, %v3190_v63  ;;  %v3230_v15 = vand.u32 4294901760, %v2142_v16  ;;  %v3232_v16 = vand.u32 4294901760, %v2147_v19 }
  0x40   : > { %291 = vmatpush.msra.mxu0 %v2210_v50  ;;  %356 = vmatpush.msra.mxu1 %v355_v37  ;;  %v384_v37 = vsub.f32 %v2253_v30, %v3176_v49  ;;  %v379_v49 = vand.u32 4294901760, %v378_v62  ;;  %v2321_v59 = vsub.f32 %v254_v47, %v2297_v13  ;;  %v396_v47 = vsub.f32 %v2280_v54, %v3185_v38 }
  0x41   : > { %442 = vmatpush.msra.mxu2 %v2219_v53  ;;  %487 = vmatpush.msra.mxu3 %v2210_v50  ;;  %v3234_v19 = vand.u32 4294901760, %v2150_v20  ;;  %v3236_v20 = vand.u32 4294901760, %v2153_v21  ;;  %v3239_v21 = vand.u32 4294901760, %v2167_v29  ;;  %v3241_v29 = vand.u32 4294901760, %v2191_v40 }
  0x42   : > { %293 = vmatpush.msra.mxu0 %v2226_v58  ;;  %362 = vmatpush.msra.mxu1 %v361_v48  ;;  %v3187_v48 = vand.u32 4294901760, %v2290_v57  ;;  %v385_v62 = vand.u32 4294901760, %v384_v37  ;;  %v391_v37 = vand.u32 4294901760, %v390_v34  ;;  %v397_v34 = vand.u32 4294901760, %v396_v47 }
  0x43   : > { %445 = vmatpush.msra.mxu2 %v2239_v2  ;;  %489 = vmatpush.msra.mxu3 %v2226_v58  ;;  %v3229_v47 = vand.u32 4294901760, %v2321_v59  ;;  %v3243_v40 = vand.u32 4294901760, %v2202_v46 }
  0x44   : > { %295 = vmatpush.msra.mxu0 %v2235_v0  ;;  %368 = vmatpush.msra.mxu1 %v367_v61  ;;  %v2330_v61 = vand.u32 4294901760, %v248_v43  ;;  %v659_v7 = vsub.f32 %v2290_v57, %v3187_v48  ;;  %v654_v48 = vand.u32 4294901760, %v653_v36  ;;  %v2372_v36 = vsub.f32 %v246_v45, %v2345_v27 }
  0x45   : > { %448 = vmatpush.msra.mxu2 %v2253_v30  ;;  %491 = vmatpush.msra.mxu3 %v2235_v0  ;;  %v671_v63 = vsub.f32 %v2321_v59, %v3229_v47 }
  0x46   : > { %297 = vmatpush.msra.mxu0 %v2250_v26  ;;  %374 = vmatpush.msra.mxu1 %v373_v6  ;;  %v244_v6 = vld [vmem:[#allocation5 + $0x170] sm:$0xff]  ;;  %v2359_v23 = vsub.f32 %v248_v43, %v2330_v61 }
  0x47   : > { %451 = vmatpush.msra.mxu2 %v2267_v42  ;;  %493 = vmatpush.msra.mxu3 %v2250_v26  ;;  %v2366_v38 = vand.u32 4294901760, %v244_v6  ;;  %v240_v43 = vld [vmem:[#allocation5 + $0x150] sm:$0xff] }
  0x48   : > { %299 = vmatpush.msra.mxu0 %v2257_v31  ;;  %380 = vmatpush.msra.mxu1 %v379_v49  ;;  %v242_v49 = vld [vmem:[#allocation5 + $0x160] sm:$0xff]  ;;  %v2391_v18 = vand.u32 4294901760, %v240_v43 }
  0x49   : > { %454 = vmatpush.msra.mxu2 %v2280_v54  ;;  %495 = vmatpush.msra.mxu3 %v2257_v31  ;;  %v2379_v31 = vand.u32 4294901760, %v242_v49  ;;  %v2389_v47 = vsub.f32 %v244_v6, %v2366_v38 }
  0x4a   : > { %506 = vmatpush.msrb.mxu0 %v311_v22  ;;  %386 = vmatpush.msra.mxu1 %v385_v62  ;;  %v660_v22 = vand.u32 4294901760, %v659_v7  ;;  %v403_v62 = vand.u32 4294901760, %v402_v60  ;;  %v238_v7 = vld [vmem:[#allocation5 + $0x140] sm:$0xff]  ;;  %v3231_v60 = vand.u32 4294901760, %v2338_v33 }
  0x4b   : > { %457 = vmatpush.msra.mxu2 %v2287_v56  ;;  %655 = vmatpush.msrb.mxu3 %v654_v48  ;;  %v2401_v6 = vsub.f32 %v242_v49, %v2379_v31  ;;  %v2403_v45 = vand.u32 4294901760, %v238_v7  ;;  %v2414_v49 = vsub.f32 %v240_v43, %v2391_v18 }
  0x4c   : > { %510 = vmatpush.msrb.mxu0 %v3228_v14  ;;  %392 = vmatpush.msra.mxu1 %v391_v37  ;;  %v666_v37 = vand.u32 4294901760, %v665_v1  ;;  %v677_v14 = vsub.f32 %v2338_v33, %v3231_v60  ;;  %v672_v1 = vand.u32 4294901760, %v671_v63 }
  0x4d   : > { %610 = vmatpush.msrb.mxu2 %v2244_v12  ;;  %661 = vmatpush.msrb.mxu3 %v660_v22  ;;  %v3235_v22 = vand.u32 4294901760, %v2359_v23  ;;  %v2427_v43 = vsub.f32 %v238_v7, %v2403_v45 }
  0x4e   : > { %514 = vmatpush.msrb.mxu0 %v3230_v15  ;;  %398 = vmatpush.msra.mxu1 %v397_v34  ;;  %v236_v15 = vld [vmem:[#allocation5 + $0x130] sm:$0xff]  ;;  %v3233_v34 = vand.u32 4294901760, %v2353_v24  ;;  %v678_v63 = vand.u32 4294901760, %v677_v14 }
  0x4f   : > { %612 = vmatpush.msrb.mxu2 %v2259_v32  ;;  %667 = vmatpush.msrb.mxu3 %v666_v37  ;;  %v2416_v48 = vand.u32 4294901760, %v236_v15 }
  0x50   : > { %518 = vmatpush.msrb.mxu0 %v3232_v16  ;;  %404 = vmatpush.msra.mxu1 %v403_v62  ;;  %v683_v60 = vsub.f32 %v2353_v24, %v3233_v34  ;;  %v689_v62 = vsub.f32 %v2359_v23, %v3235_v22  ;;  %v264_v16 = vld.sshfl [vmem:[#allocation1] sm:$0xff pattern:$0x75316420]  ;;  %v234_v22 = vld [vmem:[#allocation5 + $0x120] sm:$0xff] }
  0x51   : > { %614 = vmatpush.msrb.mxu2 %v2282_v55  ;;  %673 = vmatpush.msrb.mxu3 %v672_v1  ;;  %v2429_v34 = vand.u32 4294901760, %v264_v16  ;;  %v3240_v1 = vand.u32 4294901760, %v2389_v47  ;;  %v2439_v7 = vand.u32 4294901760, %v234_v22  ;;  %v2442_v14 = vsub.f32 %v236_v15, %v2416_v48 }
  0x52   : > { %522 = vmatpush.msrb.mxu0 %v3234_v19  ;;  %573 = vmatpush.msrb.mxu1 %v2121_v3  ;;  %v3237_v3 = vand.u32 4294901760, %v2372_v36  ;;  %v684_v37 = vand.u32 4294901760, %v683_v60 }
  0x53   : > { %616 = vmatpush.msrb.mxu2 %v2297_v13  ;;  %3238 = vst [vmem:[#allocation12_spill] sm:$0xff] %v2429_v34  ;;  %679 = vmatpush.msrb.mxu3 %v678_v63  ;;  %v701_v60 = vsub.f32 %v2389_v47, %v3240_v1  ;;  %v2453_v1 = vsub.f32 %v264_v16, %v2429_v34 }
  0x54   : > { %526 = vmatpush.msrb.mxu0 %v3236_v20  ;;  %575 = vmatpush.msrb.mxu1 %v2123_v4  ;;  %v695_v19 = vsub.f32 %v2372_v36, %v3237_v3  ;;  %v690_v4 = vand.u32 4294901760, %v689_v62  ;;  %v232_v20 = vld [vmem:[#allocation5 + $0x110] sm:$0xff]  ;;  %v3242_v62 = vand.u32 4294901760, %v2401_v6  ;;  %v230_v3 = vld [vmem:[#allocation5 + $0x100] sm:$0xff]  ;;  %v2466_v16 = vsub.f32 %v234_v22, %v2439_v7 }
  0x55   : > { %618 = vmatpush.msrb.mxu2 %v2310_v8  ;;  %685 = vmatpush.msrb.mxu3 %v684_v37  ;;  %v2455_v15 = vand.u32 4294901760, %v232_v20  ;;  %v2471_v46 = vand.u32 4294901760, %v230_v3 }
  0x56   : > { %530 = vmatpush.msrb.mxu0 %v3239_v21  ;;  %577 = vmatpush.msrb.mxu1 %v2125_v5  ;;  %v696_v5 = vand.u32 4294901760, %v695_v19  ;;  %v707_v63 = vsub.f32 %v2401_v6, %v3242_v62  ;;  %v718_v21 = vand.u32 4294901760, %v2427_v43  ;;  %v3244_v19 = vand.u32 4294901760, %v2414_v49 }
  0x57   : > { %620 = vmatpush.msrb.mxu2 %v2323_v51  ;;  %691 = vmatpush.msrb.mxu3 %v690_v4  ;;  %v3245_v62 = vand.u32 4294901760, %v2214_v52  ;;  %v2481_v22 = vsub.f32 %v232_v20, %v2455_v15  ;;  %v3247_v52 = vand.u32 4294901760, %v2219_v53  ;;  %v2495_v53 = vsub.f32 %v230_v3, %v2471_v46 }
  0x58   : > { %534 = vmatpush.msrb.mxu0 %v3241_v29  ;;  %579 = vmatpush.msrb.mxu1 %v2127_v9  ;;  %v702_v9 = vand.u32 4294901760, %v701_v60  ;;  %v713_v37 = vsub.f32 %v2414_v49, %v3244_v19  ;;  %v724_v29 = vand.u32 4294901760, %v2442_v14  ;;  %v719_v4 = vsub.f32 %v2427_v43, %v718_v21 }
  0x59   : > { %622 = vmatpush.msrb.mxu2 %v2330_v61  ;;  %697 = vmatpush.msrb.mxu3 %v696_v5  ;;  %v2478_v60 = vand.u32 4294901760, %v2453_v1  ;;  %v3248_v19 = vand.u32 4294901760, %v2239_v2  ;;  %v3251_v3 = vand.u32 4294901760, %v2267_v42  ;;  %v3254_v42 = vand.u32 4294901760, %v2287_v56 }
  0x5a   : > { %538 = vmatpush.msrb.mxu0 %v3243_v40  ;;  %581 = vmatpush.msrb.mxu1 %v2129_v10  ;;  %v708_v10 = vand.u32 4294901760, %v707_v63  ;;  %v714_v5 = vand.u32 4294901760, %v713_v37  ;;  %v725_v63 = vsub.f32 %v2442_v14, %v724_v29  ;;  %v730_v40 = vand.u32 4294901760, %v2466_v16 }
  0x5b   : > { %624 = vmatpush.msrb.mxu2 %v2345_v27  ;;  %3246 = vst [vmem:[#allocation13_spill] sm:$0xff] %v2478_v60  ;;  %703 = vmatpush.msrb.mxu3 %v702_v9  ;;  %v303_v20 = vsub.f32 %v2453_v1, %v2478_v60  ;;  %v736_v9 = vand.u32 4294901760, %v2481_v22 }
  0x5c   : > { %542 = vmatpush.msrb.mxu0 %v3245_v62  ;;  %583 = vmatpush.msrb.mxu1 %v2131_v11  ;;  %v265_v11 = vld.sshfl [vmem:[#allocation1 + $0x8] sm:$0xff pattern:$0x75316420]  ;;  %v3250_v62 = vand.u32 4294901760, %v2253_v30  ;;  %v731_v2 = vsub.f32 %v2466_v16, %v730_v40 }
  0x5d   : > { %626 = vmatpush.msrb.mxu2 %v2366_v38  ;;  %709 = vmatpush.msrb.mxu3 %v708_v10  ;;  %v2501_v37 = vand.u32 4294901760, %v265_v11  ;;  %v742_v10 = vand.u32 4294901760, %v2495_v53  ;;  %v2515_v30 = vand.u32 4294901760, %v303_v20 }
  0x5e   : > { %546 = vmatpush.msrb.mxu0 %v3247_v52  ;;  %585 = vmatpush.msrb.mxu1 %v2144_v17  ;;  %v720_v17 = vand.u32 4294901760, %v719_v4  ;;  %v3253_v52 = vand.u32 4294901760, %v2280_v54 }
  0x5f   : > { %628 = vmatpush.msrb.mxu2 %v2379_v31  ;;  %3249 = vst [vmem:[#allocation14_spill] sm:$0xff] %v2501_v37  ;;  %715 = vmatpush.msrb.mxu3 %v714_v5  ;;  %v2521_v4 = vsub.f32 %v265_v11, %v2501_v37  ;;  %v743_v5 = vsub.f32 %v2495_v53, %v742_v10 }
  0x60   : > { %550 = vmatpush.msrb.mxu0 %v3248_v19  ;;  %587 = vmatpush.msrb.mxu1 %v2160_v25  ;;  %v726_v25 = vand.u32 4294901760, %v725_v63  ;;  %v3259_v63 = vld [vmem:[#allocation11_spill] sm:$0xff] }
  0x61   : > { %630 = vmatpush.msrb.mxu2 %v2391_v18  ;;  %721 = vmatpush.msrb.mxu3 %v720_v17  ;;  %3252 = vst [vmem:[#allocation15_spill] sm:$0xff] %v2521_v4  ;;  %v213_v17 = vld [vmem:[#allocation5 + $0x78] sm:$0xff] }
  0x62   : > { %554 = vmatpush.msrb.mxu0 %v3250_v62  ;;  %589 = vmatpush.msrb.mxu1 %v2164_v28  ;;  %v737_v28 = vsub.f32 %v2481_v22, %v736_v9  ;;  %v211_v62 = vld [vmem:[#allocation5 + $0x68] sm:$0xff] }
  0x63   : > { %632 = vmatpush.msrb.mxu2 %v2403_v45  ;;  %727 = vmatpush.msrb.mxu3 %v726_v25  ;;  %v2683_v25 = vand.u32 4294901760, %v213_v17 }
  0x64   : > { %558 = vmatpush.msrb.mxu0 %v3251_v3  ;;  %591 = vmatpush.msrb.mxu1 %v2182_v35  ;;  %v732_v35 = vand.u32 4294901760, %v731_v2  ;;  %v738_v54 = vand.u32 4294901760, %v737_v28 }
  0x65   : > { %634 = vmatpush.msrb.mxu2 %v2416_v48  ;;  %305 = vmatmul.f32.vlgmr.msra.gmra.mxu0 %v2515_v30 }
  0x66   : > { %562 = vmatpush.msrb.mxu0 %v3253_v52  ;;  %593 = vmatpush.msrb.mxu1 %v2194_v41  ;;  %v2536_v41 = vand.u32 4294901760, %v2521_v4  ;;  %v209_v52 = vld [vmem:[#allocation5 + $0x58] sm:$0xff] }
  0x67   : > { %636 = vmatpush.msrb.mxu2 %v2439_v7  ;;  %733 = vmatpush.msrb.mxu3 %v732_v35 }
  0x68   : > { %566 = vmatpush.msrb.mxu0 %v3254_v42  ;;  %595 = vmatpush.msrb.mxu1 %v2210_v50  ;;  %3255 = vst [vmem:[#allocation16_spill] sm:$0xff] %v2536_v41  ;;  %v744_v50 = vand.u32 4294901760, %v743_v5  ;;  %v644_v56 = vsub.f32 %v2521_v4, %v2536_v41 }
  0x69   : > { %638 = vmatpush.msrb.mxu2 %v2455_v15  ;;  %739 = vmatpush.msrb.mxu3 %v738_v54 }
  0x6a   : > { %753 = vmatpush.msra.mxu0 %v2275_v44  ;;  %597 = vmatpush.msrb.mxu1 %v2226_v58  ;;  %v3256_v58 = vand.u32 4294901760, %v2275_v44  ;;  %v2555_v11 = vand.u32 4294901760, %v644_v56  ;;  %v3261_v44 = vand.u32 4294901760, %v2321_v59 }
  0x6b   : > { %460 = vmatmul.f32.vlgmr.msra.gmra.mxu2 %v2453_v1  ;;  %499 = vmatmul.f32.vlgmr.msra.gmra.mxu3 %v2478_v60 }
  0x6c   : > { %756 = vmatpush.msra.mxu0 %v2290_v57  ;;  %599 = vmatpush.msrb.mxu1 %v2235_v0  ;;  %v3257_v0 = vand.u32 4294901760, %v2290_v57  ;;  %3258 = vst [vmem:[#allocation17_spill] sm:$0xff] %v2555_v11  ;;  %v3268_v57 = vand.u32 4294901760, %v2414_v49 }
  0x6d   : > { %640 = vmatpush.msrb.mxu2 %v2471_v46  ;;  %745 = vmatpush.msrb.mxu3 %v744_v50  ;;  %v2710_v50 = vsub.f32 %v213_v17, %v2683_v25  ;;  %v261_v17 = vld [vmem:[#allocation5 + $0x1f8] sm:$0xff] }
  0x6e   : > { %759 = vmatpush.msra.mxu0 %v2308_v39  ;;  %601 = vmatpush.msrb.mxu1 %v2250_v26  ;;  %v3260_v26 = vand.u32 4294901760, %v2308_v39 }
  0x6f   : > { %847 = vmatpush.msra.mxu2 %v3256_v58  ;;  %406 = vmatmul.f32.vlgmr.msra.gmra.mxu1 %v2429_v34 }
  0x70   : > { %762 = vmatpush.msra.mxu0 %v2321_v59  ;;  %914 = vmatpush.msra.mxu3 %v2244_v12  ;;  %v3263_v59 = vand.u32 4294901760, %v2353_v24 }
  0x71   : > { %851 = vmatpush.msra.mxu2 %v3257_v0  ;;  %603 = vmatpush.msrb.mxu1 %v3259_v63  ;;  %v2716_v0 = vand.u32 4294901760, %v209_v52 }
  0x72   : > { %765 = vmatpush.msra.mxu0 %v2338_v33  ;;  %916 = vmatpush.msra.mxu3 %v2259_v32 }
  0x73   : > { %806 = vmatpush.msra.mxu1 %v2244_v12  ;;  %855 = vmatpush.msra.mxu2 %v3260_v26  ;;  %v3262_v12 = vand.u32 4294901760, %v2338_v33  ;;  %v3264_v33 = vand.u32 4294901760, %v2359_v23 }
  0x74   : > { %646 = vmatmul.f32.vlgmr.msrb.gmra.mxu2 %v2555_v11  ;;  %768 = vmatpush.msra.mxu0 %v2353_v24  ;;  %v229_v24 = vld [vmem:[#allocation5 + $0xf8] sm:$0xff] }
  0x75   : > { %808 = vmatpush.msra.mxu1 %v2259_v32  ;;  %859 = vmatpush.msra.mxu2 %v3261_v44  ;;  %v3265_v32 = vand.u32 4294901760, %v2372_v36  ;;  %v2603_v39 = vand.u32 4294901760, %v229_v24  ;;  %v205_v44 = vld [vmem:[#allocation5 + $0x38] sm:$0xff] }
  0x76   : > { %918 = vmatpush.msra.mxu3 %v2282_v55  ;;  %568 = vmatmul.f32.vlgmr.msrb.gmra.mxu0 %v2429_v34 }
  0x77   : > { %747 = vmatmul.f32.vlgmr.msrb.gmra.mxu3 %v2501_v37  ;;  %771 = vmatpush.msra.mxu0 %v2359_v23  ;;  %v227_v23 = vld [vmem:[#allocation5 + $0xe8] sm:$0xff] }
  0x78   : > { %810 = vmatpush.msra.mxu1 %v2282_v55  ;;  %863 = vmatpush.msra.mxu2 %v3262_v12  ;;  %v225_v55 = vld [vmem:[#allocation5 + $0xd8] sm:$0xff] }
  0x79   : > { %920 = vmatpush.msra.mxu3 %v2297_v13  ;;  %605 = vmatmul.f32.vlgmr.msrb.gmra.mxu1 %v2429_v34 }
  0x7a   : > { %774 = vmatpush.msra.mxu0 %v2372_v36  ;;  %812 = vmatpush.msra.mxu1 %v2297_v13  ;;  %v2610_v13 = vand.u32 4294901760, %v227_v23  ;;  %v221_v36 = vld [vmem:[#allocation5 + $0xb8] sm:$0xff] }
  0x7b   : > { %867 = vmatpush.msra.mxu2 %v3263_v59  ;;  %922 = vmatpush.msra.mxu3 %v2310_v8 }
  0x7c   : > { %777 = vmatpush.msra.mxu0 %v2389_v47  ;;  %814 = vmatpush.msra.mxu1 %v2310_v8  ;;  %v3266_v8 = vand.u32 4294901760, %v2389_v47  ;;  %v2630_v47 = vsub.f32 %v227_v23, %v2610_v13 }
  0x7d   : > { %871 = vmatpush.msra.mxu2 %v3264_v33  ;;  %924 = vmatpush.msra.mxu3 %v2323_v51 }
  0x7e   : > { %780 = vmatpush.msra.mxu0 %v2401_v6  ;;  %816 = vmatpush.msra.mxu1 %v2323_v51  ;;  %v3267_v51 = vand.u32 4294901760, %v2401_v6  ;;  %v219_v6 = vld [vmem:[#allocation5 + $0xa8] sm:$0xff] }
  0x7f   : > { %875 = vmatpush.msra.mxu2 %v3265_v32  ;;  %926 = vmatpush.msra.mxu3 %v2330_v61 }
  0x80   : > { %783 = vmatpush.msra.mxu0 %v2414_v49  ;;  %818 = vmatpush.msra.mxu1 %v2330_v61  ;;  %v2617_v61 = vand.u32 4294901760, %v225_v55 }
  0x81   : > { %879 = vmatpush.msra.mxu2 %v3266_v8  ;;  %928 = vmatpush.msra.mxu3 %v2345_v27  ;;  %v203_v8 = vld [vmem:[#allocation5 + $0x28] sm:$0xff] }
  0x82   : > { %786 = vmatpush.msra.mxu0 %v2427_v43  ;;  %820 = vmatpush.msra.mxu1 %v2345_v27  ;;  %v223_v27 = vld [vmem:[#allocation5 + $0xc8] sm:$0xff]  ;;  %v217_v43 = vld [vmem:[#allocation5 + $0x98] sm:$0xff] }
  0x83   : > { %883 = vmatpush.msra.mxu2 %v3267_v51  ;;  %930 = vmatpush.msra.mxu3 %v2366_v38 }
  0x84   : > { %789 = vmatpush.msra.mxu0 %v2442_v14  ;;  %822 = vmatpush.msra.mxu1 %v2366_v38  ;;  %v2620_v38 = vsub.f32 %v229_v24, %v2603_v39  ;;  %v2641_v14 = vsub.f32 %v225_v55, %v2617_v61  ;;  %v3193_v24 = vand.u32 4294901760, %v2710_v50  ;;  %v2738_v55 = vand.u32 4294901760, %v205_v44 }
  0x85   : > { %887 = vmatpush.msra.mxu2 %v3268_v57  ;;  %932 = vmatpush.msra.mxu3 %v2379_v31  ;;  %v2741_v57 = vsub.f32 %v209_v52, %v2716_v0 }
  0x86   : > { %792 = vmatpush.msra.mxu0 %v2466_v16  ;;  %824 = vmatpush.msra.mxu1 %v2379_v31  ;;  %v2627_v31 = vand.u32 4294901760, %v223_v27  ;;  %v3205_v49 = vand.u32 4294901760, %v2620_v38  ;;  %v215_v16 = vld [vmem:[#allocation5 + $0x88] sm:$0xff] }
  0x87   : > { %891 = vmatpush.msra.mxu2 %v718_v21  ;;  %934 = vmatpush.msra.mxu3 %v2391_v18  ;;  %v3203_v21 = vand.u32 4294901760, %v2630_v47  ;;  %v3194_v52 = vand.u32 4294901760, %v2741_v57 }
  0x88   : > { %795 = vmatpush.msra.mxu0 %v2481_v22  ;;  %826 = vmatpush.msra.mxu1 %v2391_v18  ;;  %v2637_v18 = vand.u32 4294901760, %v221_v36  ;;  %v2662_v22 = vand.u32 4294901760, %v217_v43 }
  0x89   : > { %895 = vmatpush.msra.mxu2 %v724_v29  ;;  %936 = vmatpush.msra.mxu3 %v2403_v45  ;;  %v2652_v29 = vsub.f32 %v223_v27, %v2627_v31 }
  0x8a   : > { %798 = vmatpush.msra.mxu0 %v2495_v53  ;;  %828 = vmatpush.msra.mxu1 %v2403_v45  ;;  %v2648_v45 = vand.u32 4294901760, %v219_v6  ;;  %v2666_v19 = vsub.f32 %v221_v36, %v2637_v18  ;;  %v2675_v53 = vand.u32 4294901760, %v215_v16  ;;  %v2692_v28 = vsub.f32 %v217_v43, %v2662_v22  ;;  %v201_v36 = vld [vmem:[#allocation5 + $0x18] sm:$0xff] }
  0x8b   : > { %899 = vmatpush.msra.mxu2 %v730_v40  ;;  %938 = vmatpush.msra.mxu3 %v2416_v48  ;;  %v3202_v40 = vand.u32 4294901760, %v2641_v14  ;;  %v3200_v20 = vand.u32 4294901760, %v2652_v29 }
  0x8c   : > { %801 = vmatmul.f32.vlgmr.msra.gmra.mxu0 %v2521_v4  ;;  %830 = vmatpush.msra.mxu1 %v2416_v48  ;;  %v994_v48 = vsub.f32 %v2620_v38, %v3205_v49  ;;  %v2705_v54 = vsub.f32 %v215_v16, %v2675_v53  ;;  %v3196_v63 = vand.u32 4294901760, %v2692_v28  ;;  %v2750_v16 = vand.u32 4294901760, %v203_v8 }
  0x8d   : > { %951 = vmatpush.msrb.mxu0 %v2603_v39  ;;  %903 = vmatpush.msra.mxu2 %v736_v9  ;;  %v2679_v9 = vsub.f32 %v219_v6, %v2648_v45  ;;  %v1006_v3 = vsub.f32 %v2641_v14, %v3202_v40  ;;  %v1012_v42 = vsub.f32 %v2652_v29, %v3200_v20 }
  0x8e   : > { %940 = vmatpush.msra.mxu3 %v2439_v7  ;;  %832 = vmatpush.msra.mxu1 %v2439_v7  ;;  %v1000_v7 = vsub.f32 %v2630_v47, %v3203_v21  ;;  %v995_v2 = vand.u32 4294901760, %v994_v48  ;;  %v3195_v32 = vand.u32 4294901760, %v2705_v54  ;;  %v1030_v51 = vsub.f32 %v2692_v28, %v3196_v63 }
  0x8f   : > { %953 = vmatpush.msrb.mxu0 %v2610_v13  ;;  %907 = vmatpush.msra.mxu2 %v742_v10  ;;  %v3199_v10 = vand.u32 4294901760, %v2666_v19  ;;  %v3197_v5 = vand.u32 4294901760, %v2679_v9  ;;  %v1007_v56 = vand.u32 4294901760, %v1006_v3  ;;  %v1013_v12 = vand.u32 4294901760, %v1012_v42 }
  0x90   : > { %942 = vmatpush.msra.mxu3 %v2455_v15  ;;  %909 = vmatmul.f32.vlgmr.msra.gmra.mxu2 %v2501_v37  ;;  %v1001_v35 = vand.u32 4294901760, %v1000_v7  ;;  %v1036_v43 = vsub.f32 %v2705_v54, %v3195_v32  ;;  %v1042_v7 = vsub.f32 %v2710_v50, %v3193_v24  ;;  %v2761_v3 = vand.u32 4294901760, %v201_v36  ;;  %v255_v24 = vld [vmem:[#allocation5 + $0x1c8] sm:$0xff] }
  0x91   : > { %955 = vmatpush.msrb.mxu0 %v2617_v61  ;;  %1094 = vmatpush.msrb.mxu2 %v2620_v38  ;;  %v1018_v58 = vsub.f32 %v2666_v19, %v3199_v10  ;;  %v1024_v59 = vsub.f32 %v2679_v9, %v3197_v5  ;;  %v253_v5 = vld [vmem:[#allocation5 + $0x1b8] sm:$0xff] }
  0x92   : > { %834 = vmatpush.msra.mxu1 %v2455_v15  ;;  %944 = vmatpush.msra.mxu3 %v2471_v46  ;;  %v2696_v15 = vand.u32 4294901760, %v211_v62  ;;  %v2823_v20 = vand.u32 4294901760, %v253_v5 }
  0x93   : > { %946 = vmatmul.f32.vlgmr.msra.gmra.mxu3 %v2501_v37  ;;  %957 = vmatpush.msrb.mxu0 %v2627_v31  ;;  %v1019_v23 = vand.u32 4294901760, %v1018_v58  ;;  %v1025_v6 = vand.u32 4294901760, %v1024_v59  ;;  %v1037_v58 = vand.u32 4294901760, %v1036_v43  ;;  %v2779_v59 = vsub.f32 %v203_v8, %v2750_v16 }
  0x94   : > { %1097 = vmatpush.msrb.mxu2 %v2630_v47  ;;  %1147 = vmatpush.msrb.mxu3 %v2603_v39  ;;  %v2722_v26 = vsub.f32 %v211_v62, %v2696_v15  ;;  %v199_v62 = vld [vmem:[#allocation5 + $0x8] sm:$0xff]  ;;  %v3271_v37 = vand.u32 4294901760, %v2620_v38 }
  0x95   : > { %836 = vmatpush.msra.mxu1 %v2471_v46  ;;  %959 = vmatpush.msrb.mxu0 %v2637_v18  ;;  %v207_v46 = vld [vmem:[#allocation5 + $0x48] sm:$0xff] }
  0x96   : > { %840 = vmatmul.f32.vlgmr.msra.gmra.mxu1 %v2536_v41  ;;  %1100 = vmatpush.msrb.mxu2 %v2641_v14  ;;  %v2728_v33 = vand.u32 4294901760, %v207_v46  ;;  %v3192_v27 = vand.u32 4294901760, %v2722_v26 }
  0x97   : > { %996 = vmatpush.msrb.mxu1 %v995_v2  ;;  %1149 = vmatpush.msrb.mxu3 %v2610_v13  ;;  %v1031_v2 = vand.u32 4294901760, %v1030_v51  ;;  %v257_v51 = vld [vmem:[#allocation5 + $0x1d8] sm:$0xff] }
  0x98   : > { %961 = vmatpush.msrb.mxu0 %v2648_v45  ;;  %1103 = vmatpush.msrb.mxu2 %v2652_v29  ;;  %v2753_v48 = vsub.f32 %v207_v46, %v2728_v33  ;;  %v1048_v42 = vsub.f32 %v2722_v26, %v3192_v27  ;;  %v2772_v46 = vand.u32 4294901760, %v261_v17  ;;  %v2789_v27 = vsub.f32 %v201_v36, %v2761_v3 }
  0x99   : > { %1002 = vmatpush.msrb.mxu1 %v1001_v35  ;;  %1151 = vmatpush.msrb.mxu3 %v2617_v61  ;;  %v2765_v35 = vsub.f32 %v205_v44, %v2738_v55  ;;  %v3204_v36 = vand.u32 4294901760, %v2779_v59  ;;  %v2806_v63 = vand.u32 4294901760, %v257_v51 }
  0x9a   : > { %963 = vmatpush.msrb.mxu0 %v2662_v22  ;;  %1106 = vmatpush.msrb.mxu2 %v2666_v19  ;;  %v3198_v44 = vand.u32 4294901760, %v2753_v48 }
  0x9b   : > { %1008 = vmatpush.msrb.mxu1 %v1007_v56  ;;  %1153 = vmatpush.msrb.mxu3 %v2627_v31  ;;  %v259_v56 = vld [vmem:[#allocation5 + $0x1e8] sm:$0xff]  ;;  %v3201_v43 = vand.u32 4294901760, %v2765_v35  ;;  %v2831_v40 = vsub.f32 %v257_v51, %v2806_v63 }
  0x9c   : > { %965 = vmatpush.msrb.mxu0 %v2675_v53  ;;  %1109 = vmatpush.msrb.mxu2 %v2679_v9  ;;  %v2791_v8 = vand.u32 4294901760, %v259_v56 }
  0x9d   : > { %1014 = vmatpush.msrb.mxu1 %v1013_v12  ;;  %1155 = vmatpush.msrb.mxu3 %v2637_v18  ;;  %v2775_v12 = vand.u32 4294901760, %v199_v62 }
  0x9e   : > { %967 = vmatpush.msrb.mxu0 %v2683_v25  ;;  %1112 = vmatpush.msrb.mxu2 %v2692_v28  ;;  %3270 = vst [vmem:[#allocation18_spill] sm:$0xff] %v2791_v8 }
  0x9f   : > { %1020 = vmatpush.msrb.mxu1 %v1019_v23  ;;  %1157 = vmatpush.msrb.mxu3 %v2648_v45  ;;  %3269 = vst [vmem:[#allocation11_spill] sm:$0xff] %v2775_v12  ;;  %v1043_v23 = vand.u32 4294901760, %v1042_v7  ;;  %v1049_v7 = vand.u32 4294901760, %v1048_v42  ;;  %v2804_v32 = vsub.f32 %v199_v62, %v2775_v12  ;;  %v3206_v62 = vand.u32 4294901760, %v2789_v27 }
  0xa0   : > { %969 = vmatpush.msrb.mxu0 %v2696_v15  ;;  %1115 = vmatpush.msrb.mxu2 %v2705_v54 }
  0xa1   : > { %1026 = vmatpush.msrb.mxu1 %v1025_v6  ;;  %1159 = vmatpush.msrb.mxu3 %v2662_v22  ;;  %v1054_v6 = vsub.f32 %v2741_v57, %v3194_v52  ;;  %v1060_v52 = vsub.f32 %v2753_v48, %v3198_v44  ;;  %v2818_v44 = vsub.f32 %v259_v56, %v2791_v8  ;;  %v3212_v56 = vand.u32 4294901760, %v2804_v32 }
  0xa2   : > { %971 = vmatpush.msrb.mxu0 %v2716_v0  ;;  %1118 = vmatpush.msrb.mxu2 %v2710_v50 }
  0xa3   : > { %1032 = vmatpush.msrb.mxu1 %v1031_v2  ;;  %1161 = vmatpush.msrb.mxu3 %v2675_v53  ;;  %v2796_v2 = vsub.f32 %v261_v17, %v2772_v46  ;;  %v2810_v17 = vand.u32 4294901760, %v255_v24  ;;  %v1055_v42 = vand.u32 4294901760, %v1054_v6  ;;  %v1061_v6 = vand.u32 4294901760, %v1060_v52 }
  0xa4   : > { %973 = vmatpush.msrb.mxu0 %v2728_v33  ;;  %1121 = vmatpush.msrb.mxu2 %v2722_v26  ;;  %v1084_v49 = vsub.f32 %v2804_v32, %v3212_v56 }
  0xa5   : > { %1038 = vmatpush.msrb.mxu1 %v1037_v58  ;;  %1163 = vmatpush.msrb.mxu3 %v2683_v25  ;;  %v1066_v58 = vsub.f32 %v2765_v35, %v3201_v43  ;;  %v3211_v10 = vand.u32 4294901760, %v2796_v2  ;;  %v1072_v43 = vsub.f32 %v2779_v59, %v3204_v36  ;;  %v2836_v21 = vsub.f32 %v255_v24, %v2810_v17 }
  0xa6   : > { %975 = vmatpush.msrb.mxu0 %v2738_v55  ;;  %1124 = vmatpush.msrb.mxu2 %v2741_v57  ;;  %v1078_v36 = vsub.f32 %v2789_v27, %v3206_v62 }
  0xa7   : > { %1044 = vmatpush.msrb.mxu1 %v1043_v23  ;;  %1165 = vmatpush.msrb.mxu3 %v2696_v15  ;;  %v251_v23 = vld [vmem:[#allocation5 + $0x1a8] sm:$0xff]  ;;  %v1067_v52 = vand.u32 4294901760, %v1066_v58  ;;  %v1335_v24 = vsub.f32 %v2796_v2, %v3211_v10  ;;  %v1073_v62 = vand.u32 4294901760, %v1072_v43  ;;  %v245_v10 = vld [vmem:[#allocation5 + $0x178] sm:$0xff] }
  0xa8   : > { %977 = vmatpush.msrb.mxu0 %v2750_v16  ;;  %1127 = vmatpush.msrb.mxu2 %v2753_v48  ;;  %v2843_v51 = vand.u32 4294901760, %v251_v23  ;;  %v247_v58 = vld [vmem:[#allocation5 + $0x188] sm:$0xff]  ;;  %v1079_v43 = vand.u32 4294901760, %v1078_v36  ;;  %v1085_v36 = vand.u32 4294901760, %v1084_v49  ;;  %v2884_v60 = vand.u32 4294901760, %v245_v10 }
  0xa9   : > { %1050 = vmatpush.msrb.mxu1 %v1049_v7  ;;  %1167 = vmatpush.msrb.mxu3 %v2716_v0  ;;  %v249_v7 = vld [vmem:[#allocation5 + $0x198] sm:$0xff]  ;;  %v2871_v11 = vand.u32 4294901760, %v247_v58  ;;  %v1336_v38 = vand.u32 4294901760, %v1335_v24  ;;  %v3276_v24 = vand.u32 4294901760, %v2836_v21 }
  0xaa   : > { %979 = vmatpush.msrb.mxu0 %v2761_v3  ;;  %1130 = vmatpush.msrb.mxu2 %v2765_v35  ;;  %v2858_v4 = vand.u32 4294901760, %v249_v7  ;;  %v2869_v41 = vsub.f32 %v251_v23, %v2843_v51 }
  0xab   : > { %1056 = vmatpush.msrb.mxu1 %v1055_v42  ;;  %1169 = vmatpush.msrb.mxu3 %v2728_v33  ;;  %v2851_v42 = vsub.f32 %v253_v5, %v2823_v20  ;;  %v243_v5 = vld [vmem:[#allocation5 + $0x168] sm:$0xff] }
  0xac   : > { %981 = vmatpush.msrb.mxu0 %v2775_v12  ;;  %1133 = vmatpush.msrb.mxu2 %v2779_v59  ;;  %v2882_v34 = vsub.f32 %v249_v7, %v2858_v4  ;;  %v2895_v7 = vsub.f32 %v247_v58, %v2871_v11  ;;  %v2907_v58 = vsub.f32 %v245_v10, %v2884_v60 }
  0xad   : > { %1062 = vmatpush.msrb.mxu1 %v1061_v6  ;;  %1171 = vmatpush.msrb.mxu3 %v2738_v55  ;;  %v3272_v6 = vand.u32 4294901760, %v2818_v44 }
  0xae   : > { %1188 = vmatpush.msra.mxu0 %v3271_v37  ;;  %1136 = vmatpush.msrb.mxu2 %v2789_v27  ;;  %v3273_v37 = vand.u32 4294901760, %v2630_v47  ;;  %v3275_v47 = vand.u32 4294901760, %v2641_v14  ;;  %v3277_v14 = vand.u32 4294901760, %v2652_v29  ;;  %v3279_v29 = vand.u32 4294901760, %v2666_v19 }
  0xaf   : > { %1068 = vmatpush.msrb.mxu1 %v1067_v52  ;;  %1173 = vmatpush.msrb.mxu3 %v2750_v16  ;;  %v1341_v56 = vsub.f32 %v2818_v44, %v3272_v6  ;;  %v3274_v6 = vand.u32 4294901760, %v2831_v40  ;;  %v2897_v52 = vand.u32 4294901760, %v243_v5  ;;  %v3281_v19 = vand.u32 4294901760, %v2679_v9 }
  0xb0   : > { %1192 = vmatpush.msra.mxu0 %v3273_v37  ;;  %1139 = vmatpush.msrb.mxu2 %v2804_v32  ;;  %v241_v37 = vld [vmem:[#allocation5 + $0x158] sm:$0xff]  ;;  %v3282_v9 = vand.u32 4294901760, %v2692_v28 }
  0xb1   : > { %1074 = vmatpush.msrb.mxu1 %v1073_v62  ;;  %1175 = vmatpush.msrb.mxu3 %v2761_v3  ;;  %v1347_v23 = vsub.f32 %v2831_v40, %v3274_v6  ;;  %v1353_v62 = vsub.f32 %v2836_v21, %v3276_v24  ;;  %v1342_v49 = vand.u32 4294901760, %v1341_v56  ;;  %v3220_v6 = vand.u32 4294901760, %v2882_v34 }
  0xb2   : > { %1196 = vmatpush.msra.mxu0 %v3275_v47  ;;  %1292 = vmatpush.msra.mxu2 %v2772_v46  ;;  %v3278_v47 = vand.u32 4294901760, %v2851_v42  ;;  %v2920_v10 = vsub.f32 %v243_v5, %v2897_v52 }
  0xb3   : > { %1080 = vmatpush.msrb.mxu1 %v1079_v43  ;;  %1177 = vmatpush.msrb.mxu3 %v2775_v12  ;;  %v239_v43 = vld [vmem:[#allocation5 + $0x148] sm:$0xff]  ;;  %v1348_v56 = vand.u32 4294901760, %v1347_v23  ;;  %v2909_v12 = vand.u32 4294901760, %v241_v37  ;;  %v1376_v23 = vand.u32 4294901760, %v2895_v7 }
  0xb4   : > { %1200 = vmatpush.msra.mxu0 %v3277_v14  ;;  %1294 = vmatpush.msra.mxu2 %v2791_v8  ;;  %v1359_v24 = vsub.f32 %v2851_v42, %v3278_v47  ;;  %v1354_v14 = vand.u32 4294901760, %v1353_v62  ;;  %v237_v8 = vld [vmem:[#allocation5 + $0x138] sm:$0xff]  ;;  %v2922_v47 = vand.u32 4294901760, %v239_v43  ;;  %v1371_v62 = vsub.f32 %v2882_v34, %v3220_v6 }
  0xb5   : > { %1337 = vmatpush.msra.mxu3 %v1336_v38  ;;  %1086 = vmatpush.msrb.mxu1 %v1085_v36  ;;  %v3280_v38 = vand.u32 4294901760, %v2869_v41  ;;  %v2933_v5 = vsub.f32 %v241_v37, %v2909_v12  ;;  %v3283_v6 = vand.u32 4294901760, %v2705_v54  ;;  %v3284_v54 = vand.u32 4294901760, %v2710_v50 }
  0xb6   : > { %1204 = vmatpush.msra.mxu0 %v3279_v29  ;;  %1296 = vmatpush.msra.mxu2 %v2806_v63  ;;  %v2935_v29 = vand.u32 4294901760, %v237_v8  ;;  %v2946_v37 = vsub.f32 %v239_v43, %v2922_v47  ;;  %v1372_v28 = vand.u32 4294901760, %v1371_v62 }
  0xb7   : > { %1255 = vmatpush.msra.mxu1 %v2603_v39  ;;  %1343 = vmatpush.msra.mxu3 %v1342_v49  ;;  %v1365_v36 = vsub.f32 %v2869_v41, %v3280_v38  ;;  %v1360_v39 = vand.u32 4294901760, %v1359_v24  ;;  %v1382_v49 = vand.u32 4294901760, %v2907_v58  ;;  %v235_v38 = vld [vmem:[#allocation5 + $0x128] sm:$0xff]  ;;  %v1377_v24 = vsub.f32 %v2895_v7, %v1376_v23 }
  0xb8   : > { %1208 = vmatpush.msra.mxu0 %v3281_v19  ;;  %1298 = vmatpush.msra.mxu2 %v2810_v17  ;;  %v233_v19 = vld [vmem:[#allocation5 + $0x118] sm:$0xff]  ;;  %v2959_v43 = vsub.f32 %v237_v8, %v2935_v29  ;;  %v3285_v8 = vand.u32 4294901760, %v2722_v26  ;;  %v3286_v26 = vand.u32 4294901760, %v2741_v57 }
  0xb9   : > { %1257 = vmatpush.msra.mxu1 %v2610_v13  ;;  %1349 = vmatpush.msra.mxu3 %v1348_v56  ;;  %v1366_v13 = vand.u32 4294901760, %v1365_v36  ;;  %v1388_v56 = vand.u32 4294901760, %v2920_v10  ;;  %v1394_v36 = vand.u32 4294901760, %v2933_v5 }
  0xba   : > { %1212 = vmatpush.msra.mxu0 %v3282_v9  ;;  %1300 = vmatpush.msra.mxu2 %v2823_v20  ;;  %v1400_v9 = vand.u32 4294901760, %v2946_v37 }
  0xbb   : > { %1259 = vmatpush.msra.mxu1 %v2617_v61  ;;  %1355 = vmatpush.msra.mxu3 %v1354_v14  ;;  %v2951_v61 = vand.u32 4294901760, %v235_v38  ;;  %v1383_v14 = vsub.f32 %v2907_v58, %v1382_v49  ;;  %v1389_v62 = vsub.f32 %v2920_v10, %v1388_v56 }
  0xbc   : > { %1216 = vmatpush.msra.mxu0 %v3283_v6  ;;  %1302 = vmatpush.msra.mxu2 %v2843_v51  ;;  %v231_v6 = vld [vmem:[#allocation5 + $0x108] sm:$0xff] }
  0xbd   : > { %1261 = vmatpush.msra.mxu1 %v2627_v31  ;;  %1361 = vmatpush.msra.mxu3 %v1360_v39  ;;  %v2964_v31 = vand.u32 4294901760, %v233_v19  ;;  %v1378_v39 = vand.u32 4294901760, %v1377_v24  ;;  %v1384_v50 = vand.u32 4294901760, %v1383_v14  ;;  %v1406_v24 = vand.u32 4294901760, %v2959_v43 }
  0xbe   : > { %1220 = vmatpush.msra.mxu0 %v3284_v54  ;;  %1304 = vmatpush.msra.mxu2 %v2858_v4  ;;  %v2982_v54 = vand.u32 4294901760, %v231_v6  ;;  %v3287_v14 = vand.u32 4294901760, %v2753_v48 }
  0xbf   : > { %1263 = vmatpush.msra.mxu1 %v2637_v18  ;;  %1367 = vmatpush.msra.mxu3 %v1366_v13  ;;  %v2975_v18 = vsub.f32 %v235_v38, %v2951_v61  ;;  %v1395_v13 = vsub.f32 %v2933_v5, %v1394_v36  ;;  %v1390_v38 = vand.u32 4294901760, %v1389_v62  ;;  %v3288_v62 = vand.u32 4294901760, %v2765_v35 }
  0xc0   : > { %1224 = vmatpush.msra.mxu0 %v3285_v8  ;;  %1306 = vmatpush.msra.mxu2 %v2871_v11  ;;  %v3289_v8 = vand.u32 4294901760, %v2779_v59 }
  0xc1   : > { %1265 = vmatpush.msra.mxu1 %v2648_v45  ;;  %1373 = vmatpush.msra.mxu3 %v1372_v28  ;;  %v2988_v45 = vsub.f32 %v233_v19, %v2964_v31  ;;  %v1401_v28 = vsub.f32 %v2946_v37, %v1400_v9  ;;  %v1412_v57 = vand.u32 4294901760, %v2975_v18  ;;  %v1407_v19 = vsub.f32 %v2959_v43, %v1406_v24 }
  0xc2   : > { %1228 = vmatpush.msra.mxu0 %v3286_v26  ;;  %1308 = vmatpush.msra.mxu2 %v2884_v60  ;;  %v3299_v26 = vld [vmem:[#allocation17_spill] sm:$0xff] }
  0xc3   : > { %1267 = vmatpush.msra.mxu1 %v2662_v22  ;;  %1379 = vmatpush.msra.mxu3 %v1378_v39  ;;  %v1396_v22 = vand.u32 4294901760, %v1395_v13  ;;  %v3003_v39 = vsub.f32 %v231_v6, %v2982_v54  ;;  %v1402_v48 = vand.u32 4294901760, %v1401_v28  ;;  %v1413_v6 = vsub.f32 %v2975_v18, %v1412_v57 }
  0xc4   : > { %1232 = vmatpush.msra.mxu0 %v3287_v14  ;;  %1310 = vmatpush.msra.mxu2 %v2897_v52  ;;  %v1408_v35 = vand.u32 4294901760, %v1407_v19 }
  0xc5   : > { %1269 = vmatpush.msra.mxu1 %v2675_v53  ;;  %1385 = vmatpush.msra.mxu3 %v1384_v50  ;;  %v1418_v53 = vand.u32 4294901760, %v2988_v45  ;;  %v3290_v50 = vand.u32 4294901760, %v2789_v27  ;;  %v1414_v13 = vand.u32 4294901760, %v1413_v6 }
  0xc6   : > { %1236 = vmatpush.msra.mxu0 %v3288_v62  ;;  %1312 = vmatpush.msra.mxu2 %v2909_v12 }
  0xc7   : > { %1271 = vmatpush.msra.mxu1 %v2683_v25  ;;  %1391 = vmatpush.msra.mxu3 %v1390_v38  ;;  %v1424_v25 = vand.u32 4294901760, %v3003_v39  ;;  %v1419_v59 = vsub.f32 %v2988_v45, %v1418_v53  ;;  %v3301_v38 = vld [vmem:[#allocation14_spill] sm:$0xff] }
  0xc8   : > { %1240 = vmatpush.msra.mxu0 %v3289_v8  ;;  %1314 = vmatpush.msra.mxu2 %v2922_v47 }
  0xc9   : > { %1273 = vmatpush.msra.mxu1 %v2696_v15  ;;  %1397 = vmatpush.msra.mxu3 %v1396_v22  ;;  %v3291_v15 = vand.u32 4294901760, %v2804_v32  ;;  %v1420_v27 = vand.u32 4294901760, %v1419_v59  ;;  %v3292_v32 = vld [vmem:[#allocation13_spill] sm:$0xff] }
  0xca   : > { %1244 = vmatpush.msra.mxu0 %v3290_v50  ;;  %1316 = vmatpush.msra.mxu2 %v2935_v29 }
  0xcb   : > { %1275 = vmatpush.msra.mxu1 %v2716_v0  ;;  %1403 = vmatpush.msra.mxu3 %v1402_v48  ;;  %v1425_v0 = vsub.f32 %v3003_v39, %v1424_v25 }
  0xcc   : > { %1248 = vmatpush.msra.mxu0 %v3291_v15  ;;  %1318 = vmatpush.msra.mxu2 %v2951_v61 }
  0xcd   : > { %1277 = vmatpush.msra.mxu1 %v2728_v33  ;;  %1409 = vmatpush.msra.mxu3 %v1408_v35  ;;  %v1426_v33 = vand.u32 4294901760, %v1425_v0 }
  0xce   : > { %987 = vmatmul.f32.vlgmr.msrb.gmra.mxu0 %v2515_v30  ;;  %1320 = vmatpush.msra.mxu2 %v2964_v31  ;;  %v3293_v30 = vand.u32 4294901760, %v2796_v2 }
  0xcf   : > { %1279 = vmatpush.msra.mxu1 %v2738_v55  ;;  %1435 = vmatpush.msrb.mxu0 %v2796_v2  ;;  %v3294_v55 = vld [vmem:[#allocation12_spill] sm:$0xff]  ;;  %v3297_v2 = vand.u32 4294901760, %v2831_v40 }
  0xd0   : > { %1415 = vmatpush.msra.mxu3 %v1414_v13  ;;  %1142 = vmatmul.f32.vlgmr.msrb.gmra.mxu2 %v2453_v1  ;;  %v3295_v1 = vand.u32 4294901760, %v2818_v44 }
  0xd1   : > { %1438 = vmatpush.msrb.mxu0 %v2818_v44  ;;  %1281 = vmatpush.msra.mxu1 %v2750_v16  ;;  %v3296_v16 = vld [vmem:[#allocation11_spill] sm:$0xff]  ;;  %v3300_v44 = vand.u32 4294901760, %v2836_v21 }
  0xd2   : > { %1322 = vmatpush.msra.mxu2 %v2982_v54  ;;  %1421 = vmatpush.msra.mxu3 %v1420_v27 }
  0xd3   : > { %1181 = vmatmul.f32.vlgmr.msrb.gmra.mxu3 %v3292_v32  ;;  %1441 = vmatpush.msrb.mxu0 %v2831_v40  ;;  %v3302_v40 = vand.u32 4294901760, %v2851_v42 }
  0xd4   : > { %1529 = vmatpush.msrb.mxu2 %v3293_v30  ;;  %1283 = vmatpush.msra.mxu1 %v2761_v3  ;;  %v3298_v3 = vld [vmem:[#allocation18_spill] sm:$0xff] }
  0xd5   : > { %1427 = vmatpush.msra.mxu3 %v1426_v33  ;;  %1088 = vmatmul.f32.vlgmr.msrb.gmra.mxu1 %v3294_v55 }
  0xd6   : > { %1444 = vmatpush.msrb.mxu0 %v2836_v21  ;;  %1533 = vmatpush.msrb.mxu2 %v3295_v1  ;;  %v3303_v21 = vand.u32 4294901760, %v2869_v41 }
  0xd7   : > { %1596 = vmatpush.msrb.mxu3 %v2772_v46  ;;  %1285 = vmatpush.msra.mxu1 %v3296_v16 }
  0xd8   : > { %1447 = vmatpush.msrb.mxu0 %v2851_v42  ;;  %1537 = vmatpush.msrb.mxu2 %v3297_v2 }
  0xd9   : > { %1488 = vmatpush.msrb.mxu1 %v2772_v46  ;;  %1598 = vmatpush.msrb.mxu3 %v3298_v3 }
  0xda   : > { %1328 = vmatmul.f32.vlgmr.msra.gmra.mxu2 %v3299_v26  ;;  %1450 = vmatpush.msrb.mxu0 %v2869_v41 }
  0xdb   : > { %1490 = vmatpush.msrb.mxu1 %v3298_v3  ;;  %1541 = vmatpush.msrb.mxu2 %v3300_v44 }
  0xdc   : > { %1600 = vmatpush.msrb.mxu3 %v2806_v63  ;;  %1250 = vmatmul.f32.vlgmr.msra.gmra.mxu0 %v3294_v55 }
  0xdd   : > { %1429 = vmatmul.f32.vlgmr.msra.gmra.mxu3 %v3301_v38  ;;  %1453 = vmatpush.msrb.mxu0 %v2882_v34 }
  0xde   : > { %1492 = vmatpush.msrb.mxu1 %v2806_v63  ;;  %1545 = vmatpush.msrb.mxu2 %v3302_v40  ;;  %v3304_v63 = vand.u32 4294901760, %v2882_v34  ;;  %v3305_v34 = vld [vmem:[#allocation15_spill] sm:$0xff] }
  0xdf   : > { %1602 = vmatpush.msrb.mxu3 %v2810_v17  ;;  %1287 = vmatmul.f32.vlgmr.msra.gmra.mxu1 %v3294_v55 }
  0xe0   : > { %1456 = vmatpush.msrb.mxu0 %v2895_v7  ;;  %1494 = vmatpush.msrb.mxu1 %v2810_v17 }
  0xe1   : > { %1549 = vmatpush.msrb.mxu2 %v3303_v21  ;;  %1604 = vmatpush.msrb.mxu3 %v2823_v20 }
  0xe2   : > { %1459 = vmatpush.msrb.mxu0 %v2907_v58  ;;  %1496 = vmatpush.msrb.mxu1 %v2823_v20  ;;  %v306_v41 = vpop.f32.mrf.mxu0 }
  0xe3   : > { %1553 = vmatpush.msrb.mxu2 %v3304_v63  ;;  %1606 = vmatpush.msrb.mxu3 %v2843_v51 }
  0xe4   : > { %1462 = vmatpush.msrb.mxu0 %v2920_v10  ;;  %1498 = vmatpush.msrb.mxu1 %v2843_v51 }
  0xe5   : > { %1557 = vmatpush.msrb.mxu2 %v1376_v23  ;;  %1608 = vmatpush.msrb.mxu3 %v2858_v4 }
  0xe6   : > { %1465 = vmatpush.msrb.mxu0 %v2933_v5  ;;  %1500 = vmatpush.msrb.mxu1 %v2858_v4 }
  0xe7   : > { %1561 = vmatpush.msrb.mxu2 %v1382_v49  ;;  %1610 = vmatpush.msrb.mxu3 %v2871_v11 }
  0xe8   : > { %1468 = vmatpush.msrb.mxu0 %v2946_v37  ;;  %1502 = vmatpush.msrb.mxu1 %v2871_v11 }
  0xe9   : > { %1565 = vmatpush.msrb.mxu2 %v1388_v56  ;;  %1612 = vmatpush.msrb.mxu3 %v2884_v60 }
  0xea   : > { %1471 = vmatpush.msrb.mxu0 %v2959_v43  ;;  %1504 = vmatpush.msrb.mxu1 %v2884_v60  ;;  %v3306_v60 = vld [vmem:[#allocation16_spill] sm:$0xff] }
  0xeb   : > { %1569 = vmatpush.msrb.mxu2 %v1394_v36  ;;  %1614 = vmatpush.msrb.mxu3 %v2897_v52 }
  0xec   : > { %1474 = vmatpush.msrb.mxu0 %v2975_v18  ;;  %1506 = vmatpush.msrb.mxu1 %v2897_v52  ;;  %v407_v4 = vpop.f32.mrf.mxu1 }
  0xed   : > { %1573 = vmatpush.msrb.mxu2 %v1400_v9  ;;  %1616 = vmatpush.msrb.mxu3 %v2909_v12  ;;  %v408_v10 = vadd.f32 %v407_v4, %v306_v41 }
  0xee   : > { %1477 = vmatpush.msrb.mxu0 %v2988_v45  ;;  %1508 = vmatpush.msrb.mxu1 %v2909_v12  ;;  %v461_v11 = vpop.f32.mrf.mxu2  ;;  %v500_v20 = vpop.f32.mrf.mxu3 }
  0xef   : > { %1577 = vmatpush.msrb.mxu2 %v1406_v24  ;;  %1618 = vmatpush.msrb.mxu3 %v2922_v47 }
  0xf0   : > { %1480 = vmatpush.msrb.mxu0 %v3003_v39  ;;  %1510 = vmatpush.msrb.mxu1 %v2922_v47 }
  0xf1   : > { %1581 = vmatpush.msrb.mxu2 %v1412_v57  ;;  %1620 = vmatpush.msrb.mxu3 %v2935_v29 }
  0xf2   : > { %1483 = vmatmul.f32.vlgmr.msrb.gmra.mxu0 %v3305_v34  ;;  %1512 = vmatpush.msrb.mxu1 %v2935_v29  ;;  %v462_v29 = vadd.f32 %v461_v11, %v408_v10 }
  0xf3   : > { %1585 = vmatpush.msrb.mxu2 %v1418_v53  ;;  %1622 = vmatpush.msrb.mxu3 %v2951_v61  ;;  %v569_v12 = vpop.f32.mrf.mxu0 }
  0xf4   : > { %1514 = vmatpush.msrb.mxu1 %v2951_v61  ;;  %v501_v61 = vadd.f32 %v500_v20, %v462_v29 }
  0xf5   : > { %1589 = vmatpush.msrb.mxu2 %v1424_v25  ;;  %1624 = vmatpush.msrb.mxu3 %v2964_v31 }
  0xf6   : > { %1591 = vmatmul.f32.vlgmr.msrb.gmra.mxu2 %v3301_v38  ;;  %1516 = vmatpush.msrb.mxu1 %v2964_v31  ;;  %v606_v46 = vpop.f32.mrf.mxu1  ;;  %v570_v31 = vadd.f32 %v569_v12, %v501_v61 }
  0xf7   : > { %1626 = vmatpush.msrb.mxu3 %v2982_v54  ;;  %v647_v17 = vpop.f32.mrf.mxu2 }
  0xf8   : > { %1628 = vmatmul.f32.vlgmr.msrb.gmra.mxu3 %v3301_v38  ;;  %1518 = vmatpush.msrb.mxu1 %v2982_v54  ;;  %v607_v24 = vadd.f32 %v606_v46, %v570_v31 }
  0xf9   : > { %1522 = vmatmul.f32.vlgmr.msrb.gmra.mxu1 %v3306_v60 }
  0xfa   : > { %v748_v51 = vpop.f32.mrf.mxu3  ;;  %v648_v28 = vadd.f32 %v647_v17, %v607_v24 }
  0xfc   : > { %v749_v22 = vadd.f32 %v748_v51, %v648_v28 }
 0x109   : > { %v802_v52 = vpop.f32.mrf.mxu0 }
 0x10a   : > { %v803_v62 = vadd.f32 %v802_v52, %v749_v22 }
 0x113   : > { %v841_v42 = vpop.f32.mrf.mxu1  ;;  %v910_v7 = vpop.f32.mrf.mxu2 }
 0x114   : > { %v842_v48 = vadd.f32 %v841_v42, %v803_v62 }
 0x116   : > { %v947_v58 = vpop.f32.mrf.mxu3  ;;  %v911_v25 = vadd.f32 %v910_v7, %v842_v48 }
 0x118   : > { %v948_v13 = vadd.f32 %v947_v58, %v911_v25 }
 0x14b   : > { %v988_v47 = vpop.f32.mrf.mxu0 }
 0x152   : > { %v1089_v23 = vpop.f32.mrf.mxu1 }
 0x153   : > { %v1090_v49 = vadd.f32 %v1089_v23, %v988_v47  ;;  %v1143_v5 = vpop.f32.mrf.mxu2 }
 0x155   : > { %v1144_v56 = vadd.f32 %v1143_v5, %v1090_v49 }
 0x156   : > { %v1182_v37 = vpop.f32.mrf.mxu3 }
 0x157   : > { %v1183_v36 = vadd.f32 %v1182_v37, %v1144_v56 }
 0x159   : > { %v1251_v43 = vpop.f32.mrf.mxu0 }
 0x15a   : > { %v1252_v9 = vadd.f32 %v1251_v43, %v1183_v36 }
 0x15c   : > { %v1288_v18 = vpop.f32.mrf.mxu1 }
 0x15d   : > { %v1289_v54 = vadd.f32 %v1288_v18, %v1252_v9  ;;  %v1329_v45 = vpop.f32.mrf.mxu2 }
 0x15f   : > { %v1330_v14 = vadd.f32 %v1329_v45, %v1289_v54 }
 0x160   : > { %v1430_v57 = vpop.f32.mrf.mxu3 }
 0x161   : > { %v1431_v39 = vadd.f32 %v1430_v57, %v1330_v14 }
 0x16f   : > { %v1484_v19 = vpop.f32.mrf.mxu0 }
 0x170   : > { %v1485_v53 = vadd.f32 %v1484_v19, %v1431_v39 }
 0x176   : > { %v1523_v8 = vpop.f32.mrf.mxu1 }
 0x177   : > { %v1524_v6 = vadd.f32 %v1523_v8, %v1485_v53 }
 0x179   : > { %v1592_v35 = vpop.f32.mrf.mxu2 }
 0x17a   : > { %v1593_v50 = vadd.f32 %v1592_v35, %v1524_v6 }
 0x17b   : > { %v1629_v59 = vpop.f32.mrf.mxu3 }
 0x17c   : > { %v1630_v15 = vadd.f32 %v1629_v59, %v1593_v50 }
 0x17e   : > { %v1634_v0 = vrot.slane %v1630_v15, 4 }
 0x180   : > { %v1636_v27 = vsel %vm1635_vm0, %v948_v13, %v1634_v0 }
 0x181   : > { %1638 = vst [vmem:[%s196_s6] sm:$0xff] %v1636_v27 }
 0x182   : > { %1933 = shalt.err (!%p1930_p13)
}
 0x183   : > { %1777 = dma.vmem_to_hbm [thread:$0]  (%p2083_p4), %s1656_s7, 128, %s1658_s8, %s1640_s12  }
 0x184 PF: > { %s1669_s24 = sand.u32 1, %s1972_s9   ;;  %p1788_p0 = pnand %p1756_p6, %p2091_p7 }
 0x185   : > { %s1670_s25 = scalar_lea.sflag [#allocation4], %s1669_s24 }
 0x186   : > { %p1789_p2 = pneg %p1788_p0 }
 0x188   : > { %1967 = dma.done.wait (%p1789_p2), %s1670_s25, 128  }
 0x189   : > { %1969 = vsyncadd (%p1789_p2), %s1670_s25, 4294967168  ;;  %s19_s14 = sadd.s32 1, %s1992_s14   ;;  %s3307_s9 = smov %s1976_s10 }
 0x18a   : > { %p16_p5 = scmp.ge.s32.totalorder %s19_s14, 4   ;;  %s3308_s10 = smov %s1980_s11 }
 0x18b   : > { %s3309_s11 = smov %s2089_s4  ;;  %s3310_s12 = smov %s1988_s13 }
 0x18c   : > { %s3311_s13 = smov %s3313_s26  ;;  %18 = sbr.rel (!%p16_p5) target bundleno = 7 (0x7), region = 77 }
 0x191   :  { %1676 = vsyncpa [#allocation3], 1 }
 0x192   :  { %1678 = vsyncpa [#allocation3 + $0x1], 1 }
 0x193   :  { %1679 = vsyncpa [#allocation6], 1 }
 0x194   :  { %1680 = vsyncpa [#allocation4], 1 }
 0x195   :  { %1682 = vsyncpa [#allocation4 + $0x1], 1 }

</bundles_post_ra>
